<compile_context>
chip_gen: v7x
topology: tpu7x:2x2x1
jax: 0.10.0
libtpu: 0.0.40
codegen_flags: <defaults>
</compile_context>

<pallas_src>
from functools import partial

import jax
import jax.numpy as jnp
from jax.experimental import pallas as pl
from jax.experimental.pallas import tpu as pltpu


def _round_up(n, m):
    return ((n + m - 1) // m) * m


def ffn_kernel(xm_ref, xp_ref, xn_ref, w1_ref, b1_ref, w2_ref, b2_ref,
               gamma_ref, beta_ref, out_ref, *, K1, p1, T, eps):
    tile_t = xm_ref.shape[1]
    halo = xp_ref.shape[1]
    t0 = pl.program_id(1) * tile_t                      # global start row of this tile

    # Main tile rows; zero anything past the sequence end (the last block may
    # extend past T and then contains garbage that must not leak into the conv
    # window of the last valid row).
    row = jax.lax.broadcasted_iota(jnp.int32, (tile_t, 1), 0)
    xm = xm_ref[0]                                      # (tile_t, d_in)
    xm = jnp.where(row + t0 < T, xm, jnp.zeros_like(xm))

    # Residual comes straight from the aligned main tile -- single DMA stream.
    res = xm.astype(jnp.float32)

    # Conv1d(d_in -> d_hid, K1) as K1 accumulated MXU matmuls.  The center tap
    # uses the aligned tile directly; shifted taps assemble their window from
    # the tile plus p1 rows of the prev/next halo blocks, masked to zero where
    # they fall outside [0, T) (== the conv zero padding).
    acc = jnp.dot(xm, w1_ref[p1], preferred_element_type=jnp.float32)
    if K1 > 1:
        prev_all = xp_ref[0]                            # rows [t0-halo, t0)
        nxt_all = xn_ref[0]                             # rows [t0+tile_t, ...)
        prev = prev_all[halo - p1:, :]                  # rows t0-p1 .. t0-1
        prev = jnp.where(t0 > 0, prev, jnp.zeros_like(prev))
        nxt = nxt_all[:p1, :]                           # rows t0+tile_t .. +p1-1
        nxt = jnp.where(row[:p1] + (t0 + tile_t) < T, nxt, jnp.zeros_like(nxt))
        for k in range(K1):
            d = k - p1
            if d == 0:
                continue
            if d < 0:
                win = jnp.concatenate([prev[p1 + d:, :], xm[:tile_t + d, :]], axis=0)
            else:
                win = jnp.concatenate([xm[d:, :], nxt[:d, :]], axis=0)
            acc += jnp.dot(win, w1_ref[k], preferred_element_type=jnp.float32)

    h = jnp.maximum(acc + b1_ref[...], 0.0)             # bias + ReLU (f32)

    # Conv1d(d_hid -> d_in, kernel=1) == matmul; operands in activation dtype.
    o = jnp.dot(h.astype(w2_ref.dtype), w2_ref[...],
                preferred_element_type=jnp.float32) + b2_ref[...]

    # TODO(synk): dropout omitted (identity at inference / eval mode).
    o = o + res

    # LayerNorm over d_in (two-pass biased variance, matches nn.LayerNorm).
    mean = jnp.mean(o, axis=-1, keepdims=True)
    var = jnp.mean((o - mean) ** 2, axis=-1, keepdims=True)
    o = (o - mean) * jax.lax.rsqrt(var + eps)
    o = o * gamma_ref[...] + beta_ref[...]

    out_ref[0] = o.astype(out_ref.dtype)


def positionwise_ffn(x, w1, b1, w2, b2, gamma, beta, *,
                     fft_conv1d_kernel=(3, 1), fft_conv1d_padding=(1, 0),
                     eps=1e-5, tile_t=512, vmem_limit_bytes=None):
    """x: (B, T, d_in).  w1: (d_hid, d_in, K1), w2: (d_in, d_hid, 1) (PyTorch layout)."""
    B, T, d_in = x.shape
    K1, K2 = fft_conv1d_kernel
    p1, p2 = fft_conv1d_padding
    assert K2 == 1 and p2 == 0, "second conv is pointwise in this config"
    assert 2 * p1 == K1 - 1, "need 'same' conv so the residual add is shape-valid"
    d_hid = w1.shape[0]

    # Sublane packing of the activation dtype: 8 rows f32, 16 bf16, 32 int8.
    pack = max(8, 32 // x.dtype.itemsize)
    halo = pack
    assert p1 <= halo, "halo block only covers paddings up to the sublane packing"

    # Time tiling: big tiles amortize per-grid-step overhead; clamp for short T.
    tile_t = max(pack, min(_round_up(tile_t, pack), _round_up(T, pack)))
    n_t = -(-T // tile_t)                       # ceil(T / tile_t)
    bpt = tile_t // halo                        # halo blocks per tile
    last_halo_blk = max(-(-T // halo) - 1, 0)   # last valid halo-block index

    # Weights in matmul layout, kept in the activation dtype for full-rate MXU.
    w1_mat = jnp.transpose(w1, (2, 1, 0)).astype(x.dtype)            # (K1, d_in, d_hid)
    w2_mat = jnp.transpose(w2[:, :, 0], (1, 0)).astype(x.dtype)      # (d_hid, d_in)
    b1_r = b1.reshape(1, d_hid).astype(jnp.float32)
    b2_r = b2.reshape(1, d_in).astype(jnp.float32)
    gamma_r = gamma.reshape(1, d_in).astype(jnp.float32)
    beta_r = beta.reshape(1, d_in).astype(jnp.float32)

    # Explicit scoped-VMEM limit (v5e default is only 16 MiB; cap at v7x's 64 MiB).
    if vmem_limit_bytes is None:
        isz = x.dtype.itemsize
        est = (4 * tile_t * d_in * isz                  # in + out tiles, double-buffered
               + 4 * halo * d_in * isz                  # two halo blocks, double-buffered
               + (K1 + 1) * d_in * d_hid * isz          # w1 + w2 (single-buffered)
               + (d_hid + 3 * d_in) * 4                 # biases / LN params
               + tile_t * d_hid * 4                     # f32 hidden accumulator
               + 3 * tile_t * d_in * 4)                 # window / residual temporaries
        vmem_limit_bytes = int(min(max(2 * est + (8 << 20), 32 << 20), 64 << 20))

    kern = partial(ffn_kernel, K1=K1, p1=p1, T=T, eps=eps)
    const2 = lambda b, t: (0, 0)

    def make_call(single_buffer_weights):
        wmode = (dict(pipeline_mode=pl.Buffered(1))
                 if single_buffer_weights else {})
        return pl.pallas_call(
            kern,
            out_shape=jax.ShapeDtypeStruct((B, T, d_in), x.dtype),
            grid=(B, n_t),
            in_specs=[
                # main tile rows of the activation
                pl.BlockSpec((1, tile_t, d_in), lambda b, t: (b, t, 0)),
                # sublane-aligned halo block just BEFORE the tile (clamped at t=0,
                # its rows are zero-gated in-kernel when they fall before row 0)
                pl.BlockSpec((1, halo, d_in),
                             lambda b, t: (b, jnp.maximum(t * bpt - 1, 0), 0)),
                # sublane-aligned halo block just AFTER the tile (clamped at the
                # sequence end, rows >= T are zero-masked in-kernel)
                pl.BlockSpec((1, halo, d_in),
                             lambda b, t: (b, jnp.minimum((t + 1) * bpt, last_halo_blk), 0)),
                # constant-index weights / params (single-buffered when supported)
                pl.BlockSpec((K1, d_in, d_hid), lambda b, t: (0, 0, 0), **wmode),
                pl.BlockSpec((1, d_hid), const2, **wmode),
                pl.BlockSpec((d_hid, d_in), const2, **wmode),
                pl.BlockSpec((1, d_in), const2, **wmode),
                pl.BlockSpec((1, d_in), const2, **wmode),
                pl.BlockSpec((1, d_in), const2, **wmode),
            ],
            # The last output block may extend past T; Pallas drops OOB rows, so
            # no post-kernel out[:, :T] slice (and no extra HBM round-trip).
            out_specs=pl.BlockSpec((1, tile_t, d_in), lambda b, t: (b, t, 0)),
            compiler_params=pltpu.CompilerParams(
                dimension_semantics=("parallel", "parallel"),
                vmem_limit_bytes=vmem_limit_bytes),
        )

    args = (x, x, x, w1_mat, b1_r, w2_mat, b2_r, gamma_r, beta_r)
    try:
        return make_call(True)(*args)
    except Exception:
        # Older jax without BlockSpec(pipeline_mode=...) support: identical
        # kernel, default (double) buffering for the constant weight blocks.
        return make_call(False)(*args)


def _reference(x, w1, b1, w2, b2, gamma, beta, p1, eps=1e-5):
    """Pure-JAX reference mirroring the PyTorch module (eval mode)."""
    xt = jnp.transpose(x, (0, 2, 1))                      # (B, d_in, T)
    h = jax.lax.conv_general_dilated(
        xt, w1, window_strides=(1,), padding=[(p1, p1)],
        dimension_numbers=("NCH", "OIH", "NCH")) + b1[None, :, None]
    h = jnp.maximum(h, 0.0)
    o = jax.lax.conv_general_dilated(
        h, w2, window_strides=(1,), padding=[(0, 0)],
        dimension_numbers=("NCH", "OIH", "NCH")) + b2[None, :, None]
    o = jnp.transpose(o, (0, 2, 1)) + x
    mean = jnp.mean(o, axis=-1, keepdims=True)
    var = jnp.mean((o - mean) ** 2, axis=-1, keepdims=True)
    return (o - mean) * jax.lax.rsqrt(var + eps) * gamma + beta


if __name__ == "__main__":
    key = jax.random.PRNGKey(0)
    kx, kw1, kb1, kw2, kb2, kx2, kx3 = jax.random.split(key, 7)

    K1, K2 = 3, 1
    p1, p2 = 1, 0
    d_in, d_hid = 32, 64

    # PyTorch Conv1d weight layout (out, in, K); LayerNorm default init.
    w1 = jax.random.normal(kw1, (d_hid, d_in, K1), jnp.float32) * 0.1
    b1 = jax.random.normal(kb1, (d_hid,), jnp.float32) * 0.1
    w2 = jax.random.normal(kw2, (d_in, d_hid, K2), jnp.float32) * 0.1
    b2 = jax.random.normal(kb2, (d_in,), jnp.float32) * 0.1
    gamma = jnp.ones((d_in,), jnp.float32)
    beta = jnp.zeros((d_in,), jnp.float32)

    # Test 1: single time tile (default tile_t clamps to T); fully-OOB next halo.
    B, T = 2, 8
    x = jax.random.normal(kx, (B, T, d_in), jnp.float32)
    out = positionwise_ffn(x, w1, b1, w2, b2, gamma, beta,
                           fft_conv1d_kernel=(K1, K2),
                           fft_conv1d_padding=(p1, p2))
    out = jax.block_until_ready(out)
    ref = _reference(x, w1, b1, w2, b2, gamma, beta, p1)
    assert out.shape == (B, T, d_in)
    assert jnp.allclose(out, ref, atol=1e-4, rtol=1e-4), "mismatch vs reference (T=8)"

    # Test 2: T not a multiple of the tile -> multi-tile grid, cross-tile halos,
    # masked tail rows and dropped OOB output rows.
    B2, T2 = 2, 20
    x2 = jax.random.normal(kx2, (B2, T2, d_in), jnp.float32)
    out2 = positionwise_ffn(x2, w1, b1, w2, b2, gamma, beta,
                            fft_conv1d_kernel=(K1, K2),
                            fft_conv1d_padding=(p1, p2), tile_t=8)
    out2 = jax.block_until_ready(out2)
    ref2 = _reference(x2, w1, b1, w2, b2, gamma, beta, p1)
    assert out2.shape == (B2, T2, d_in)
    assert jnp.allclose(out2, ref2, atol=1e-4, rtol=1e-4), "mismatch vs reference (T=20)"

    # Test 3: tile larger than one halo block (bpt > 1) plus a ragged last tile.
    B3, T3 = 1, 40
    x3 = jax.random.normal(kx3, (B3, T3, d_in), jnp.float32)
    out3 = positionwise_ffn(x3, w1, b1, w2, b2, gamma, beta,
                            fft_conv1d_kernel=(K1, K2),
                            fft_conv1d_padding=(p1, p2), tile_t=16)
    out3 = jax.block_until_ready(out3)
    ref3 = _reference(x3, w1, b1, w2, b2, gamma, beta, p1)
    assert out3.shape == (B3, T3, d_in)
    assert jnp.allclose(out3, ref3, atol=1e-4, rtol=1e-4), "mismatch vs reference (T=40)"

    print("KERNEL_OK")
</pallas_src>

<mosaic_0001>
module attributes {stable_mosaic.version = 11 : i64} {
  func.func @ffn_kernel(%arg0: i32, %arg1: i32, %arg2: memref<1x8x32xf32, #tpu.memory_space<vmem>>, %arg3: memref<1x8x32xf32, #tpu.memory_space<vmem>>, %arg4: memref<1x8x32xf32, #tpu.memory_space<vmem>>, %arg5: memref<3x32x64xf32, #tpu.memory_space<vmem>>, %arg6: memref<1x64xf32, #tpu.memory_space<vmem>>, %arg7: memref<64x32xf32, #tpu.memory_space<vmem>>, %arg8: memref<1x32xf32, #tpu.memory_space<vmem>>, %arg9: memref<1x32xf32, #tpu.memory_space<vmem>>, %arg10: memref<1x32xf32, #tpu.memory_space<vmem>>, %arg11: memref<1x8x32xf32, #tpu.memory_space<vmem>>) attributes {dimension_semantics = [#tpu.dimension_semantics<parallel>, #tpu.dimension_semantics<parallel>], iteration_bounds = array<i64: 2, 1>, scalar_prefetch = 0 : i64, scratch_operands = 0 : i64, tpu.core_type = #tpu.core_type<tc>, window_params = [{transform_indices = @transform_0, window_bounds = array<i64: 1, 8, 32>}, {transform_indices = @transform_1, window_bounds = array<i64: 1, 8, 32>}, {transform_indices = @transform_2, window_bounds = array<i64: 1, 8, 32>}, {pipeline_mode = #tpu.pipeline_mode<synchronous>, transform_indices = @transform_3, window_bounds = array<i64: 3, 32, 64>}, {pipeline_mode = #tpu.pipeline_mode<synchronous>, transform_indices = @transform_4, window_bounds = array<i64: 1, 64>}, {pipeline_mode = #tpu.pipeline_mode<synchronous>, transform_indices = @transform_5, window_bounds = array<i64: 64, 32>}, {pipeline_mode = #tpu.pipeline_mode<synchronous>, transform_indices = @transform_6, window_bounds = array<i64: 1, 32>}, {pipeline_mode = #tpu.pipeline_mode<synchronous>, transform_indices = @transform_7, window_bounds = array<i64: 1, 32>}, {pipeline_mode = #tpu.pipeline_mode<synchronous>, transform_indices = @transform_8, window_bounds = array<i64: 1, 32>}, {transform_indices = @transform_9, window_bounds = array<i64: 1, 8, 32>}]} {
    %c8_i32 = arith.constant 8 : i32
    %0 = arith.muli %arg1, %c8_i32 : i32
    %1 = tpu.iota {dimensions = array<i32: 0>} : vector<8x1xi32>
    %c0 = arith.constant 0 : index
    %c0_0 = arith.constant 0 : index
    %c0_1 = arith.constant 0 : index
    %2 = vector.load %arg2[%c0, %c0_0, %c0_1] : memref<1x8x32xf32, #tpu.memory_space<vmem>>, vector<1x8x32xf32>
    %3 = vector.shape_cast %2 : vector<1x8x32xf32> to vector<8x32xf32>
    %4 = vector.broadcast %0 : i32 to vector<8x1xi32>
    %5 = arith.addi %1, %4 : vector<8x1xi32>
    %c8_i32_2 = arith.constant 8 : i32
    %6 = vector.broadcast %c8_i32_2 : i32 to vector<8x1xi32>
    %7 = arith.cmpi slt, %5, %6 : vector<8x1xi32>
    %cst = arith.constant 0.000000e+00 : f32
    %8 = vector.broadcast %cst : f32 to vector<8x32xf32>
    %9 = vector.shape_cast %7 : vector<8x1xi1> to vector<8x1xi1>
    %10 = vector.broadcast %9 : vector<8x1xi1> to vector<8x32xi1>
    %11 = arith.select %10, %3, %8 : vector<8x32xi1>, vector<8x32xf32>
    %c1 = arith.constant 1 : index
    %c0_3 = arith.constant 0 : index
    %c0_4 = arith.constant 0 : index
    %12 = vector.load %arg5[%c1, %c0_3, %c0_4] : memref<3x32x64xf32, #tpu.memory_space<vmem>>, vector<1x32x64xf32>
    %13 = vector.shape_cast %12 : vector<1x32x64xf32> to vector<32x64xf32>
    %cst_5 = arith.constant dense<0.000000e+00> : vector<8x64xf32>
    %14 = tpu.matmul %11, %13, %cst_5 {dimension_numbers = #tpu.dot_dimension_numbers<[1], [0], [0], [1], [0, 0, 1, 1], [], []>} : vector<8x32xf32>, vector<32x64xf32>, vector<8x64xf32> -> vector<8x64xf32>
    %c0_6 = arith.constant 0 : index
    %c0_7 = arith.constant 0 : index
    %c0_8 = arith.constant 0 : index
    %15 = vector.load %arg3[%c0_6, %c0_7, %c0_8] : memref<1x8x32xf32, #tpu.memory_space<vmem>>, vector<1x8x32xf32>
    %16 = vector.shape_cast %15 : vector<1x8x32xf32> to vector<8x32xf32>
    %c0_9 = arith.constant 0 : index
    %c0_10 = arith.constant 0 : index
    %c0_11 = arith.constant 0 : index
    %17 = vector.load %arg4[%c0_9, %c0_10, %c0_11] : memref<1x8x32xf32, #tpu.memory_space<vmem>>, vector<1x8x32xf32>
    %18 = vector.shape_cast %17 : vector<1x8x32xf32> to vector<8x32xf32>
    %19 = vector.extract_strided_slice %16 {offsets = [7, 0], sizes = [1, 32], strides = [1, 1]} : vector<8x32xf32> to vector<1x32xf32>
    %c0_i32 = arith.constant 0 : i32
    %20 = arith.cmpi sgt, %0, %c0_i32 : i32
    %cst_12 = arith.constant 0.000000e+00 : f32
    %21 = vector.broadcast %cst_12 : f32 to vector<1x32xf32>
    %22 = arith.select %20, %19, %21 : vector<1x32xf32>
    %23 = vector.extract_strided_slice %18 {offsets = [0, 0], sizes = [1, 32], strides = [1, 1]} : vector<8x32xf32> to vector<1x32xf32>
    %24 = vector.extract_strided_slice %1 {offsets = [0, 0], sizes = [1, 1], strides = [1, 1]} : vector<8x1xi32> to vector<1x1xi32>
    %c8_i32_13 = arith.constant 8 : i32
    %25 = arith.addi %0, %c8_i32_13 : i32
    %26 = vector.broadcast %25 : i32 to vector<1x1xi32>
    %27 = arith.addi %24, %26 : vector<1x1xi32>
    %c8_i32_14 = arith.constant 8 : i32
    %28 = vector.broadcast %c8_i32_14 : i32 to vector<1x1xi32>
    %29 = arith.cmpi slt, %27, %28 : vector<1x1xi32>
    %cst_15 = arith.constant 0.000000e+00 : f32
    %30 = vector.broadcast %cst_15 : f32 to vector<1x32xf32>
    %31 = vector.shape_cast %29 : vector<1x1xi1> to vector<1x1xi1>
    %32 = vector.broadcast %31 : vector<1x1xi1> to vector<1x32xi1>
    %33 = arith.select %32, %23, %30 : vector<1x32xi1>, vector<1x32xf32>
    %34 = vector.extract_strided_slice %11 {offsets = [0, 0], sizes = [7, 32], strides = [1, 1]} : vector<8x32xf32> to vector<7x32xf32>
    %35 = tpu.concatenate %22, %34 in 0 : vector<1x32xf32>, vector<7x32xf32> -> vector<8x32xf32>
    %c0_16 = arith.constant 0 : index
    %c0_17 = arith.constant 0 : index
    %c0_18 = arith.constant 0 : index
    %36 = vector.load %arg5[%c0_16, %c0_17, %c0_18] : memref<3x32x64xf32, #tpu.memory_space<vmem>>, vector<1x32x64xf32>
    %37 = vector.shape_cast %36 : vector<1x32x64xf32> to vector<32x64xf32>
    %cst_19 = arith.constant dense<0.000000e+00> : vector<8x64xf32>
    %38 = tpu.matmul %35, %37, %cst_19 {dimension_numbers = #tpu.dot_dimension_numbers<[1], [0], [0], [1], [0, 0, 1, 1], [], []>} : vector<8x32xf32>, vector<32x64xf32>, vector<8x64xf32> -> vector<8x64xf32>
    %39 = arith.addf %14, %38 : vector<8x64xf32>
    %40 = vector.extract_strided_slice %11 {offsets = [1, 0], sizes = [7, 32], strides = [1, 1]} : vector<8x32xf32> to vector<7x32xf32>
    %41 = tpu.concatenate %40, %33 in 0 : vector<7x32xf32>, vector<1x32xf32> -> vector<8x32xf32>
    %c2 = arith.constant 2 : index
    %c0_20 = arith.constant 0 : index
    %c0_21 = arith.constant 0 : index
    %42 = vector.load %arg5[%c2, %c0_20, %c0_21] : memref<3x32x64xf32, #tpu.memory_space<vmem>>, vector<1x32x64xf32>
    %43 = vector.shape_cast %42 : vector<1x32x64xf32> to vector<32x64xf32>
    %cst_22 = arith.constant dense<0.000000e+00> : vector<8x64xf32>
    %44 = tpu.matmul %41, %43, %cst_22 {dimension_numbers = #tpu.dot_dimension_numbers<[1], [0], [0], [1], [0, 0, 1, 1], [], []>} : vector<8x32xf32>, vector<32x64xf32>, vector<8x64xf32> -> vector<8x64xf32>
    %45 = arith.addf %39, %44 : vector<8x64xf32>
    %c0_23 = arith.constant 0 : index
    %c0_24 = arith.constant 0 : index
    %46 = vector.load %arg6[%c0_23, %c0_24] : memref<1x64xf32, #tpu.memory_space<vmem>>, vector<1x64xf32>
    %47 = vector.broadcast %46 : vector<1x64xf32> to vector<8x64xf32>
    %48 = arith.addf %45, %47 : vector<8x64xf32>
    %cst_25 = arith.constant 0.000000e+00 : f32
    %49 = vector.broadcast %cst_25 : f32 to vector<8x64xf32>
    %50 = arith.maximumf %48, %49 : vector<8x64xf32>
    %c0_26 = arith.constant 0 : index
    %c0_27 = arith.constant 0 : index
    %51 = vector.load %arg7[%c0_26, %c0_27] : memref<64x32xf32, #tpu.memory_space<vmem>>, vector<64x32xf32>
    %cst_28 = arith.constant dense<0.000000e+00> : vector<8x32xf32>
    %52 = tpu.matmul %50, %51, %cst_28 {dimension_numbers = #tpu.dot_dimension_numbers<[1], [0], [0], [1], [0, 0, 1, 1], [], []>} : vector<8x64xf32>, vector<64x32xf32>, vector<8x32xf32> -> vector<8x32xf32>
    %c0_29 = arith.constant 0 : index
    %c0_30 = arith.constant 0 : index
    %53 = vector.load %arg8[%c0_29, %c0_30] : memref<1x32xf32, #tpu.memory_space<vmem>>, vector<1x32xf32>
    %54 = vector.broadcast %53 : vector<1x32xf32> to vector<8x32xf32>
    %55 = arith.addf %52, %54 : vector<8x32xf32>
    %56 = arith.addf %55, %11 : vector<8x32xf32>
    %cst_31 = arith.constant dense<0.000000e+00> : vector<8xf32>
    %57 = vector.multi_reduction <add>, %56, %cst_31 [1] : vector<8x32xf32> to vector<8xf32>
    %58 = vector.shape_cast %57 : vector<8xf32> to vector<8x1xf32>
    %cst_32 = arith.constant 3.200000e+01 : f32
    %59 = vector.broadcast %cst_32 : f32 to vector<8x1xf32>
    %60 = arith.divf %58, %59 : vector<8x1xf32>
    %61 = vector.broadcast %60 : vector<8x1xf32> to vector<8x32xf32>
    %62 = arith.subf %56, %61 : vector<8x32xf32>
    %63 = arith.mulf %62, %62 : vector<8x32xf32>
    %cst_33 = arith.constant dense<0.000000e+00> : vector<8xf32>
    %64 = vector.multi_reduction <add>, %63, %cst_33 [1] : vector<8x32xf32> to vector<8xf32>
    %65 = vector.shape_cast %64 : vector<8xf32> to vector<8x1xf32>
    %cst_34 = arith.constant 3.200000e+01 : f32
    %66 = vector.broadcast %cst_34 : f32 to vector<8x1xf32>
    %67 = arith.divf %65, %66 : vector<8x1xf32>
    %68 = vector.broadcast %60 : vector<8x1xf32> to vector<8x32xf32>
    %69 = arith.subf %56, %68 : vector<8x32xf32>
    %cst_35 = arith.constant 9.99999974E-6 : f32
    %70 = vector.broadcast %cst_35 : f32 to vector<8x1xf32>
    %71 = arith.addf %67, %70 : vector<8x1xf32>
    %72 = math.rsqrt %71 : vector<8x1xf32>
    %73 = vector.broadcast %72 : vector<8x1xf32> to vector<8x32xf32>
    %74 = arith.mulf %69, %73 : vector<8x32xf32>
    %c0_36 = arith.constant 0 : index
    %c0_37 = arith.constant 0 : index
    %75 = vector.load %arg9[%c0_36, %c0_37] : memref<1x32xf32, #tpu.memory_space<vmem>>, vector<1x32xf32>
    %76 = vector.broadcast %75 : vector<1x32xf32> to vector<8x32xf32>
    %77 = arith.mulf %74, %76 : vector<8x32xf32>
    %c0_38 = arith.constant 0 : index
    %c0_39 = arith.constant 0 : index
    %78 = vector.load %arg10[%c0_38, %c0_39] : memref<1x32xf32, #tpu.memory_space<vmem>>, vector<1x32xf32>
    %79 = vector.broadcast %78 : vector<1x32xf32> to vector<8x32xf32>
    %80 = arith.addf %77, %79 : vector<8x32xf32>
    %c0_40 = arith.constant 0 : index
    %c0_41 = arith.constant 0 : index
    %c0_42 = arith.constant 0 : index
    %81 = vector.load %arg11[%c0_40, %c0_41, %c0_42] : memref<1x8x32xf32, #tpu.memory_space<vmem>>, vector<1x8x32xf32>
    %82 = vector.shape_cast %81 : vector<1x8x32xf32> to vector<8x32xf32>
    %83 = vector.shape_cast %80 : vector<8x32xf32> to vector<1x8x32xf32>
    tpu.vector_store %arg11[%c0_40, %c0_41, %c0_42], %83 {strides = array<i32>} : memref<1x8x32xf32, #tpu.memory_space<vmem>>, vector<1x8x32xf32>,
    return
  }
  func.func @transform_0(%arg0: i32, %arg1: i32) -> (i32, i32, i32) {
    %c0_i32 = arith.constant 0 : i32
    %c0_i32_0 = arith.constant 0 : i32
    return %arg0, %arg1, %c0_i32 : i32, i32, i32
  }
  func.func @transform_1(%arg0: i32, %arg1: i32) -> (i32, i32, i32) {
    %c1_i32 = arith.constant 1 : i32
    %0 = arith.muli %arg1, %c1_i32 : i32
    %c1_i32_0 = arith.constant 1 : i32
    %1 = arith.subi %0, %c1_i32_0 : i32
    %c0_i32 = arith.constant 0 : i32
    %2 = arith.maxsi %1, %c0_i32 : i32
    %c0_i32_1 = arith.constant 0 : i32
    %c0_i32_2 = arith.constant 0 : i32
    return %arg0, %2, %c0_i32_1 : i32, i32, i32
  }
  func.func @transform_2(%arg0: i32, %arg1: i32) -> (i32, i32, i32) {
    %c1_i32 = arith.constant 1 : i32
    %0 = arith.addi %arg1, %c1_i32 : i32
    %c1_i32_0 = arith.constant 1 : i32
    %1 = arith.muli %0, %c1_i32_0 : i32
    %c0_i32 = arith.constant 0 : i32
    %2 = arith.minsi %1, %c0_i32 : i32
    %c0_i32_1 = arith.constant 0 : i32
    %c0_i32_2 = arith.constant 0 : i32
    return %arg0, %2, %c0_i32_1 : i32, i32, i32
  }
  func.func @transform_3(%arg0: i32, %arg1: i32) -> (i32, i32, i32) {
    %c0_i32 = arith.constant 0 : i32
    %c0_i32_0 = arith.constant 0 : i32
    %c0_i32_1 = arith.constant 0 : i32
    %c0_i32_2 = arith.constant 0 : i32
    return %c0_i32, %c0_i32_0, %c0_i32_1 : i32, i32, i32
  }
  func.func @transform_4(%arg0: i32, %arg1: i32) -> (i32, i32) {
    %c0_i32 = arith.constant 0 : i32
    %c0_i32_0 = arith.constant 0 : i32
    %c0_i32_1 = arith.constant 0 : i32
    return %c0_i32, %c0_i32_0 : i32, i32
  }
  func.func @transform_5(%arg0: i32, %arg1: i32) -> (i32, i32) {
    %c0_i32 = arith.constant 0 : i32
    %c0_i32_0 = arith.constant 0 : i32
    %c0_i32_1 = arith.constant 0 : i32
    return %c0_i32, %c0_i32_0 : i32, i32
  }
  func.func @transform_6(%arg0: i32, %arg1: i32) -> (i32, i32) {
    %c0_i32 = arith.constant 0 : i32
    %c0_i32_0 = arith.constant 0 : i32
    %c0_i32_1 = arith.constant 0 : i32
    return %c0_i32, %c0_i32_0 : i32, i32
  }
  func.func @transform_7(%arg0: i32, %arg1: i32) -> (i32, i32) {
    %c0_i32 = arith.constant 0 : i32
    %c0_i32_0 = arith.constant 0 : i32
    %c0_i32_1 = arith.constant 0 : i32
    return %c0_i32, %c0_i32_0 : i32, i32
  }
  func.func @transform_8(%arg0: i32, %arg1: i32) -> (i32, i32) {
    %c0_i32 = arith.constant 0 : i32
    %c0_i32_0 = arith.constant 0 : i32
    %c0_i32_1 = arith.constant 0 : i32
    return %c0_i32, %c0_i32_0 : i32, i32
  }
  func.func @transform_9(%arg0: i32, %arg1: i32) -> (i32, i32, i32) {
    %c0_i32 = arith.constant 0 : i32
    %c0_i32_0 = arith.constant 0 : i32
    return %arg0, %arg1, %c0_i32 : i32, i32, i32
  }
}

module attributes {stable_mosaic.version = 11 : i64} {
  func.func @ffn_kernel(%arg0: i32, %arg1: i32, %arg2: memref<1x8x32xf32, #tpu.memory_space<vmem>>, %arg3: memref<1x8x32xf32, #tpu.memory_space<vmem>>, %arg4: memref<1x8x32xf32, #tpu.memory_space<vmem>>, %arg5: memref<3x32x64xf32, #tpu.memory_space<vmem>>, %arg6: memref<1x64xf32, #tpu.memory_space<vmem>>, %arg7: memref<64x32xf32, #tpu.memory_space<vmem>>, %arg8: memref<1x32xf32, #tpu.memory_space<vmem>>, %arg9: memref<1x32xf32, #tpu.memory_space<vmem>>, %arg10: memref<1x32xf32, #tpu.memory_space<vmem>>, %arg11: memref<1x8x32xf32, #tpu.memory_space<vmem>>) attributes {dimension_semantics = [#tpu.dimension_semantics<parallel>, #tpu.dimension_semantics<parallel>], iteration_bounds = array<i64: 2, 1>, scalar_prefetch = 0 : i64, scratch_operands = 0 : i64, tpu.core_type = #tpu.core_type<tc>, window_params = [{transform_indices = @transform_0, window_bounds = array<i64: 1, 8, 32>}, {transform_indices = @transform_1, window_bounds = array<i64: 1, 8, 32>}, {transform_indices = @transform_2, window_bounds = array<i64: 1, 8, 32>}, {pipeline_mode = #tpu.pipeline_mode<synchronous>, transform_indices = @transform_3, window_bounds = array<i64: 3, 32, 64>}, {pipeline_mode = #tpu.pipeline_mode<synchronous>, transform_indices = @transform_4, window_bounds = array<i64: 1, 64>}, {pipeline_mode = #tpu.pipeline_mode<synchronous>, transform_indices = @transform_5, window_bounds = array<i64: 64, 32>}, {pipeline_mode = #tpu.pipeline_mode<synchronous>, transform_indices = @transform_6, window_bounds = array<i64: 1, 32>}, {pipeline_mode = #tpu.pipeline_mode<synchronous>, transform_indices = @transform_7, window_bounds = array<i64: 1, 32>}, {pipeline_mode = #tpu.pipeline_mode<synchronous>, transform_indices = @transform_8, window_bounds = array<i64: 1, 32>}, {transform_indices = @transform_9, window_bounds = array<i64: 1, 8, 32>}]} {
    %c8_i32 = arith.constant 8 : i32
    %0 = arith.muli %arg1, %c8_i32 : i32
    %1 = tpu.iota {dimensions = array<i32: 0>} : vector<8x1xi32>
    %c0 = arith.constant 0 : index
    %c0_0 = arith.constant 0 : index
    %c0_1 = arith.constant 0 : index
    %2 = vector.load %arg2[%c0, %c0_0, %c0_1] : memref<1x8x32xf32, #tpu.memory_space<vmem>>, vector<1x8x32xf32>
    %3 = vector.shape_cast %2 : vector<1x8x32xf32> to vector<8x32xf32>
    %4 = vector.broadcast %0 : i32 to vector<8x1xi32>
    %5 = arith.addi %1, %4 : vector<8x1xi32>
    %c8_i32_2 = arith.constant 8 : i32
    %6 = vector.broadcast %c8_i32_2 : i32 to vector<8x1xi32>
    %7 = arith.cmpi slt, %5, %6 : vector<8x1xi32>
    %cst = arith.constant 0.000000e+00 : f32
    %8 = vector.broadcast %cst : f32 to vector<8x32xf32>
    %9 = vector.shape_cast %7 : vector<8x1xi1> to vector<8x1xi1>
    %10 = vector.broadcast %9 : vector<8x1xi1> to vector<8x32xi1>
    %11 = arith.select %10, %3, %8 : vector<8x32xi1>, vector<8x32xf32>
    %c1 = arith.constant 1 : index
    %c0_3 = arith.constant 0 : index
    %c0_4 = arith.constant 0 : index
    %12 = vector.load %arg5[%c1, %c0_3, %c0_4] : memref<3x32x64xf32, #tpu.memory_space<vmem>>, vector<1x32x64xf32>
    %13 = vector.shape_cast %12 : vector<1x32x64xf32> to vector<32x64xf32>
    %cst_5 = arith.constant dense<0.000000e+00> : vector<8x64xf32>
    %14 = tpu.matmul %11, %13, %cst_5 {dimension_numbers = #tpu.dot_dimension_numbers<[1], [0], [0], [1], [0, 0, 1, 1], [], []>} : vector<8x32xf32>, vector<32x64xf32>, vector<8x64xf32> -> vector<8x64xf32>
    %c0_6 = arith.constant 0 : index
    %c0_7 = arith.constant 0 : index
    %c0_8 = arith.constant 0 : index
    %15 = vector.load %arg3[%c0_6, %c0_7, %c0_8] : memref<1x8x32xf32, #tpu.memory_space<vmem>>, vector<1x8x32xf32>
    %16 = vector.shape_cast %15 : vector<1x8x32xf32> to vector<8x32xf32>
    %c0_9 = arith.constant 0 : index
    %c0_10 = arith.constant 0 : index
    %c0_11 = arith.constant 0 : index
    %17 = vector.load %arg4[%c0_9, %c0_10, %c0_11] : memref<1x8x32xf32, #tpu.memory_space<vmem>>, vector<1x8x32xf32>
    %18 = vector.shape_cast %17 : vector<1x8x32xf32> to vector<8x32xf32>
    %19 = vector.extract_strided_slice %16 {offsets = [7, 0], sizes = [1, 32], strides = [1, 1]} : vector<8x32xf32> to vector<1x32xf32>
    %c0_i32 = arith.constant 0 : i32
    %20 = arith.cmpi sgt, %0, %c0_i32 : i32
    %cst_12 = arith.constant 0.000000e+00 : f32
    %21 = vector.broadcast %cst_12 : f32 to vector<1x32xf32>
    %22 = arith.select %20, %19, %21 : vector<1x32xf32>
    %23 = vector.extract_strided_slice %18 {offsets = [0, 0], sizes = [1, 32], strides = [1, 1]} : vector<8x32xf32> to vector<1x32xf32>
    %24 = vector.extract_strided_slice %1 {offsets = [0, 0], sizes = [1, 1], strides = [1, 1]} : vector<8x1xi32> to vector<1x1xi32>
    %c8_i32_13 = arith.constant 8 : i32
    %25 = arith.addi %0, %c8_i32_13 : i32
    %26 = vector.broadcast %25 : i32 to vector<1x1xi32>
    %27 = arith.addi %24, %26 : vector<1x1xi32>
    %c8_i32_14 = arith.constant 8 : i32
    %28 = vector.broadcast %c8_i32_14 : i32 to vector<1x1xi32>
    %29 = arith.cmpi slt, %27, %28 : vector<1x1xi32>
    %cst_15 = arith.constant 0.000000e+00 : f32
    %30 = vector.broadcast %cst_15 : f32 to vector<1x32xf32>
    %31 = vector.shape_cast %29 : vector<1x1xi1> to vector<1x1xi1>
    %32 = vector.broadcast %31 : vector<1x1xi1> to vector<1x32xi1>
    %33 = arith.select %32, %23, %30 : vector<1x32xi1>, vector<1x32xf32>
    %34 = vector.extract_strided_slice %11 {offsets = [0, 0], sizes = [7, 32], strides = [1, 1]} : vector<8x32xf32> to vector<7x32xf32>
    %35 = tpu.concatenate %22, %34 in 0 : vector<1x32xf32>, vector<7x32xf32> -> vector<8x32xf32>
    %c0_16 = arith.constant 0 : index
    %c0_17 = arith.constant 0 : index
    %c0_18 = arith.constant 0 : index
    %36 = vector.load %arg5[%c0_16, %c0_17, %c0_18] : memref<3x32x64xf32, #tpu.memory_space<vmem>>, vector<1x32x64xf32>
    %37 = vector.shape_cast %36 : vector<1x32x64xf32> to vector<32x64xf32>
    %cst_19 = arith.constant dense<0.000000e+00> : vector<8x64xf32>
    %38 = tpu.matmul %35, %37, %cst_19 {dimension_numbers = #tpu.dot_dimension_numbers<[1], [0], [0], [1], [0, 0, 1, 1], [], []>} : vector<8x32xf32>, vector<32x64xf32>, vector<8x64xf32> -> vector<8x64xf32>
    %39 = arith.addf %14, %38 : vector<8x64xf32>
    %40 = vector.extract_strided_slice %11 {offsets = [1, 0], sizes = [7, 32], strides = [1, 1]} : vector<8x32xf32> to vector<7x32xf32>
    %41 = tpu.concatenate %40, %33 in 0 : vector<7x32xf32>, vector<1x32xf32> -> vector<8x32xf32>
    %c2 = arith.constant 2 : index
    %c0_20 = arith.constant 0 : index
    %c0_21 = arith.constant 0 : index
    %42 = vector.load %arg5[%c2, %c0_20, %c0_21] : memref<3x32x64xf32, #tpu.memory_space<vmem>>, vector<1x32x64xf32>
    %43 = vector.shape_cast %42 : vector<1x32x64xf32> to vector<32x64xf32>
    %cst_22 = arith.constant dense<0.000000e+00> : vector<8x64xf32>
    %44 = tpu.matmul %41, %43, %cst_22 {dimension_numbers = #tpu.dot_dimension_numbers<[1], [0], [0], [1], [0, 0, 1, 1], [], []>} : vector<8x32xf32>, vector<32x64xf32>, vector<8x64xf32> -> vector<8x64xf32>
    %45 = arith.addf %39, %44 : vector<8x64xf32>
    %c0_23 = arith.constant 0 : index
    %c0_24 = arith.constant 0 : index
    %46 = vector.load %arg6[%c0_23, %c0_24] : memref<1x64xf32, #tpu.memory_space<vmem>>, vector<1x64xf32>
    %47 = vector.broadcast %46 : vector<1x64xf32> to vector<8x64xf32>
    %48 = arith.addf %45, %47 : vector<8x64xf32>
    %cst_25 = arith.constant 0.000000e+00 : f32
    %49 = vector.broadcast %cst_25 : f32 to vector<8x64xf32>
    %50 = arith.maximumf %48, %49 : vector<8x64xf32>
    %c0_26 = arith.constant 0 : index
    %c0_27 = arith.constant 0 : index
    %51 = vector.load %arg7[%c0_26, %c0_27] : memref<64x32xf32, #tpu.memory_space<vmem>>, vector<64x32xf32>
    %cst_28 = arith.constant dense<0.000000e+00> : vector<8x32xf32>
    %52 = tpu.matmul %50, %51, %cst_28 {dimension_numbers = #tpu.dot_dimension_numbers<[1], [0], [0], [1], [0, 0, 1, 1], [], []>} : vector<8x64xf32>, vector<64x32xf32>, vector<8x32xf32> -> vector<8x32xf32>
    %c0_29 = arith.constant 0 : index
    %c0_30 = arith.constant 0 : index
    %53 = vector.load %arg8[%c0_29, %c0_30] : memref<1x32xf32, #tpu.memory_space<vmem>>, vector<1x32xf32>
    %54 = vector.broadcast %53 : vector<1x32xf32> to vector<8x32xf32>
    %55 = arith.addf %52, %54 : vector<8x32xf32>
    %56 = arith.addf %55, %11 : vector<8x32xf32>
    %cst_31 = arith.constant dense<0.000000e+00> : vector<8xf32>
    %57 = vector.multi_reduction <add>, %56, %cst_31 [1] : vector<8x32xf32> to vector<8xf32>
    %58 = vector.shape_cast %57 : vector<8xf32> to vector<8x1xf32>
    %cst_32 = arith.constant 3.200000e+01 : f32
    %59 = vector.broadcast %cst_32 : f32 to vector<8x1xf32>
    %60 = arith.divf %58, %59 : vector<8x1xf32>
    %61 = vector.broadcast %60 : vector<8x1xf32> to vector<8x32xf32>
    %62 = arith.subf %56, %61 : vector<8x32xf32>
    %63 = arith.mulf %62, %62 : vector<8x32xf32>
    %cst_33 = arith.constant dense<0.000000e+00> : vector<8xf32>
    %64 = vector.multi_reduction <add>, %63, %cst_33 [1] : vector<8x32xf32> to vector<8xf32>
    %65 = vector.shape_cast %64 : vector<8xf32> to vector<8x1xf32>
    %cst_34 = arith.constant 3.200000e+01 : f32
    %66 = vector.broadcast %cst_34 : f32 to vector<8x1xf32>
    %67 = arith.divf %65, %66 : vector<8x1xf32>
    %68 = vector.broadcast %60 : vector<8x1xf32> to vector<8x32xf32>
    %69 = arith.subf %56, %68 : vector<8x32xf32>
    %cst_35 = arith.constant 9.99999974E-6 : f32
    %70 = vector.broadcast %cst_35 : f32 to vector<8x1xf32>
    %71 = arith.addf %67, %70 : vector<8x1xf32>
    %72 = math.rsqrt %71 : vector<8x1xf32>
    %73 = vector.broadcast %72 : vector<8x1xf32> to vector<8x32xf32>
    %74 = arith.mulf %69, %73 : vector<8x32xf32>
    %c0_36 = arith.constant 0 : index
    %c0_37 = arith.constant 0 : index
    %75 = vector.load %arg9[%c0_36, %c0_37] : memref<1x32xf32, #tpu.memory_space<vmem>>, vector<1x32xf32>
    %76 = vector.broadcast %75 : vector<1x32xf32> to vector<8x32xf32>
    %77 = arith.mulf %74, %76 : vector<8x32xf32>
    %c0_38 = arith.constant 0 : index
    %c0_39 = arith.constant 0 : index
    %78 = vector.load %arg10[%c0_38, %c0_39] : memref<1x32xf32, #tpu.memory_space<vmem>>, vector<1x32xf32>
    %79 = vector.broadcast %78 : vector<1x32xf32> to vector<8x32xf32>
    %80 = arith.addf %77, %79 : vector<8x32xf32>
    %c0_40 = arith.constant 0 : index
    %c0_41 = arith.constant 0 : index
    %c0_42 = arith.constant 0 : index
    %81 = vector.load %arg11[%c0_40, %c0_41, %c0_42] : memref<1x8x32xf32, #tpu.memory_space<vmem>>, vector<1x8x32xf32>
    %82 = vector.shape_cast %81 : vector<1x8x32xf32> to vector<8x32xf32>
    %83 = vector.shape_cast %80 : vector<8x32xf32> to vector<1x8x32xf32>
    tpu.vector_store %arg11[%c0_40, %c0_41, %c0_42], %83 {strides = array<i32>} : memref<1x8x32xf32, #tpu.memory_space<vmem>>, vector<1x8x32xf32>,
    return
  }
  func.func @transform_0(%arg0: i32, %arg1: i32) -> (i32, i32, i32) {
    %c0_i32 = arith.constant 0 : i32
    %c0_i32_0 = arith.constant 0 : i32
    return %arg0, %arg1, %c0_i32 : i32, i32, i32
  }
  func.func @transform_1(%arg0: i32, %arg1: i32) -> (i32, i32, i32) {
    %c1_i32 = arith.constant 1 : i32
    %0 = arith.muli %arg1, %c1_i32 : i32
    %c1_i32_0 = arith.constant 1 : i32
    %1 = arith.subi %0, %c1_i32_0 : i32
    %c0_i32 = arith.constant 0 : i32
    %2 = arith.maxsi %1, %c0_i32 : i32
    %c0_i32_1 = arith.constant 0 : i32
    %c0_i32_2 = arith.constant 0 : i32
    return %arg0, %2, %c0_i32_1 : i32, i32, i32
  }
  func.func @transform_2(%arg0: i32, %arg1: i32) -> (i32, i32, i32) {
    %c1_i32 = arith.constant 1 : i32
    %0 = arith.addi %arg1, %c1_i32 : i32
    %c1_i32_0 = arith.constant 1 : i32
    %1 = arith.muli %0, %c1_i32_0 : i32
    %c0_i32 = arith.constant 0 : i32
    %2 = arith.minsi %1, %c0_i32 : i32
    %c0_i32_1 = arith.constant 0 : i32
    %c0_i32_2 = arith.constant 0 : i32
    return %arg0, %2, %c0_i32_1 : i32, i32, i32
  }
  func.func @transform_3(%arg0: i32, %arg1: i32) -> (i32, i32, i32) {
    %c0_i32 = arith.constant 0 : i32
    %c0_i32_0 = arith.constant 0 : i32
    %c0_i32_1 = arith.constant 0 : i32
    %c0_i32_2 = arith.constant 0 : i32
    return %c0_i32, %c0_i32_0, %c0_i32_1 : i32, i32, i32
  }
  func.func @transform_4(%arg0: i32, %arg1: i32) -> (i32, i32) {
    %c0_i32 = arith.constant 0 : i32
    %c0_i32_0 = arith.constant 0 : i32
    %c0_i32_1 = arith.constant 0 : i32
    return %c0_i32, %c0_i32_0 : i32, i32
  }
  func.func @transform_5(%arg0: i32, %arg1: i32) -> (i32, i32) {
    %c0_i32 = arith.constant 0 : i32
    %c0_i32_0 = arith.constant 0 : i32
    %c0_i32_1 = arith.constant 0 : i32
    return %c0_i32, %c0_i32_0 : i32, i32
  }
  func.func @transform_6(%arg0: i32, %arg1: i32) -> (i32, i32) {
    %c0_i32 = arith.constant 0 : i32
    %c0_i32_0 = arith.constant 0 : i32
    %c0_i32_1 = arith.constant 0 : i32
    return %c0_i32, %c0_i32_0 : i32, i32
  }
  func.func @transform_7(%arg0: i32, %arg1: i32) -> (i32, i32) {
    %c0_i32 = arith.constant 0 : i32
    %c0_i32_0 = arith.constant 0 : i32
    %c0_i32_1 = arith.constant 0 : i32
    return %c0_i32, %c0_i32_0 : i32, i32
  }
  func.func @transform_8(%arg0: i32, %arg1: i32) -> (i32, i32) {
    %c0_i32 = arith.constant 0 : i32
    %c0_i32_0 = arith.constant 0 : i32
    %c0_i32_1 = arith.constant 0 : i32
    return %c0_i32, %c0_i32_0 : i32, i32
  }
  func.func @transform_9(%arg0: i32, %arg1: i32) -> (i32, i32, i32) {
    %c0_i32 = arith.constant 0 : i32
    %c0_i32_0 = arith.constant 0 : i32
    return %arg0, %arg1, %c0_i32 : i32, i32, i32
  }
}

</mosaic_0001>

<bundles_post_ra>
// kernel: tpu_custom_call.1
= control target key start
LH: loop header
LB: loop body
LE: loop exit
PB: predicated region body
PF: predicated region fallthrough
CT: control target
= control target key end

     0   :  { %s1822_s0 = inlined_call_operand.hbm [shape: f32[2,8,32], index: 0, kind: input, shape index: {}]   ;;  %s1823_s1 = inlined_call_operand.hbm [shape: f32[2,8,32], index: 1, kind: input, shape index: {}]   ;;  %s1824_s2 = inlined_call_operand.hbm [shape: f32[2,8,32], index: 2, kind: input, shape index: {}]   ;;  %s1825_s3 = inlined_call_operand.vmem [shape: f32[3,32,64], index: 3, kind: input, shape index: {}]   ;;  %s1826_s4 = inlined_call_operand.vmem [shape: f32[1,64], index: 4, kind: input, shape index: {}]   ;;  %s1827_s5 = inlined_call_operand.vmem [shape: f32[64,32], index: 5, kind: input, shape index: {}]   ;;  %s1828_s6 = inlined_call_operand.vmem [shape: f32[1,32], index: 6, kind: input, shape index: {}]   ;;  %s1829_s7 = inlined_call_operand.vmem [shape: f32[1,32], index: 7, kind: input, shape index: {}]   ;;  %s1830_s8 = inlined_call_operand.vmem [shape: f32[1,32], index: 8, kind: input, shape index: {}]   ;;  %s1831_s9 = inlined_call_operand.hbm [shape: f32[2,8,32], index: 9, kind: output, shape index: {}]  }
   0x1   :  { %1843 = sst [smem:[#allocation18_spill]] %s1823_s1 }
   0x2   :  { %1844 = sst [smem:[#allocation19_spill]] %s1829_s7 }
   0x3   :  { %1845 = sst [smem:[#allocation20_spill]] %s1830_s8 }
   0x4   :  { %1846 = sst [smem:[#allocation21_spill]] %s1831_s9 }
   0x5   :  { %14 = vsyncpa [#allocation3], 0 }
   0x6   :  { %16 = vsyncpa [#allocation3 + $0x1], 0 }
   0x7   :  { %17 = vsyncpa [#allocation6], 0 }
   0x8   :  { %19 = vsyncpa [#allocation6 + $0x1], 0 }
   0x9   :  { %20 = vsyncpa [#allocation4], 0 }
   0xa   :  { %22 = vsyncpa [#allocation4 + $0x1], 0  ;;  %s1462_s30 = smov 0   ;;  %s1464_s10 = smov 0  }
   0xb   :  { %s1466_s11 = smov 0   ;;  %s1468_s12 = smov 0  }
   0xc   :  { %s1470_s13 = smov 0   ;;  %s1472_s14 = smov 0  }
   0xd LB: > { %1847 = sst [smem:[#allocation12_spill]] %s1383_s30  ;;  %s1493_s15 = sadd.s32 4294967295, %s1403_s14   ;;  %s1403_s14 = sphi %s1472_s14, %s28_s14   ;;  %s1399_s13 = sphi %s1470_s13, %s1878_s13   ;;  %s1395_s12 = sphi %s1468_s12, %s1877_s12   ;;  %s1391_s11 = sphi %s1466_s11, %s1881_s11   ;;  %s1387_s10 = sphi %s1464_s10, %s1880_s10   ;;  %s1383_s30 = sphi %s1462_s30, %s1879_s30  }
   0xe   : > { %1848 = sst [smem:[#allocation13_spill]] %s1399_s13  ;;  %s1010_s16 = sadd.s32 4294967294, %s1403_s14  }
   0xf   : > { %1849 = sst [smem:[#allocation14_spill]] %s1403_s14  ;;  %s40_s17 = sadd.s32 1, %s1399_s13 }
  0x10   : > { %s49_s18 = sadd.s32 1, %s1391_s11  ;;  %p42_p0 = scmp.ge.s32.totalorder %s40_s17, 2 }
  0x11   : > { %p56_p1 = scmp.ne.s32.totalorder %s1391_s11, %s1387_s10  ;;  %p57_p2 = scmp.eq.s32.totalorder %s1403_s14, 0 }
  0x12   : > { %p62_p3 = scmp.ne.s32.totalorder %s1387_s10, %s1383_s30  ;;  %s1883_s17 = smov (%p42_p0, %s40_s17), 0 }
  0x13   : > { %1850 = sst [smem:[#allocation15_spill]] %s1883_s17  ;;  %p1505_p4 = por %p57_p2, %p56_p1 }
  0x14   : > { %p63_p5 = scmp.eq.s32.totalorder %s1493_s15, 0  ;;  %s44_s20 = ssub.s32 %s1399_s13, %s1883_s17 }
  0x15   : > { %p282_p6 = scmp.eq.s32.totalorder %s1493_s15, 1  ;;  %p47_p7 = scmp.eq.s32.totalorder %s44_s20, 0 }
  0x16   : > { %p1513_p8 = por %p63_p5, %p62_p3  ;;  %p288_p10 = scmp.eq.s32.totalorder %s1010_s16, 1 }
  0x17   : > { %p1517_p9 = por %p282_p6, %p56_p1  ;;  %p1172_p13 = scmp.lt.s32.totalorder %s1403_s14, 2 }
  0x18   : > { %s1852_s21 = scalar_select %p1513_p8, 1, 0 }
  0x19   : > { %s1853_s22 = scalar_select %p1517_p9, 1, 0 }
  0x1a   : > { %s1522_s23 = scalar_select %p47_p7, %s1391_s11, %s49_s18  }
  0x1b   : > { %p1524_p11 = por %p288_p10, %p62_p3  ;;  %s1832_s25 = sand.u32 1, %s1391_s11  }
  0x1c   : > { %1854 = sst [smem:[#allocation16_spill]] %s1522_s23  ;;  %s1533_s26 = sshll.u32 %s1832_s25, 3 }
  0x1d   : > { %s1855_s24 = scalar_select %p1524_p11, 1, 0 }
  0x1e   : > { %s1536_s27 = sshll.u32 %s1399_s13, 7  ;;  %p1540_p0 = pnand %p1172_p13, %p1505_p4 }
  0x1f   : > { %1856 = sst [smem:[#allocation17_spill]] %s1855_s24  ;;  %s345_s29 = sand.u32 1, %s1403_s14  }
  0x20   : > { %s1857_s28 = scalar_select %p1540_p0, 1, 0 }
  0x21   : > { %s1858_s1 = sld [smem:[#allocation18_spill]]  ;;  %s349_s25 = scalar_lea.vmem [#allocation5], %s1533_s26 }
  0x22   : > { %s360_s17 = sshll.u32 %s349_s25, 4  ;;  %s1556_s19 = scalar_lea.sflag [#allocation6], %s345_s29  ;;  %s1553_s17 = int_to_ptr.vmem [resolvable:$true] %s360_s17 }
  0x23   : > { %p1562_p4 = pneg %p1540_p0 }
  0x27   : > { %s1549_s20 = scalar_lea.hbm %s1858_s1, %s1536_s27  ;;  %s1232_s25 = scalar_lea.hbm %s1858_s1, 256 }
  0x28   : > { %s1227_s13 = scalar_lea.hbm %s1549_s20, 128  ;;  %p1233_p7 = scmp.lt.u32.totalorder %s1549_s20, %s1858_s1 }
  0x29   : > { %p1228_p3 = scmp.ne.s32.totalorder %s1549_s20, %s1227_s13  ;;  %p1234_p10 = scmp.lt.u32.totalorder %s1232_s25, %s1227_s13 }
  0x2a   : > { %p1236_p12 = scmp.lt.u32.totalorder %s1227_s13, %s1549_s20 }
  0x2b   : > { %p1230_p5 = pnand %p1562_p4, %p1228_p3  ;;  %p1235_p13 = por %p1234_p10, %p1233_p7 }
  0x2d   : > { %p1231_p6 = pneg %p1230_p5  ;;  %p1237_p1 = por %p1236_p12, %p1235_p13 }
  0x2f   : > { %p1238_p2 = pnand %p1237_p1, %p1231_p6 }
  0x31   : > { %1241 = shalt.err (!%p1238_p2)
}
  0x32   : > { %s1242_s29 = scalar_lea.vmem %s1553_s17, 128  ;;  %s1405_s16 = smov [#allocation5]  }
  0x33   : > { %p1243_p3 = scmp.ne.s32.totalorder %s1553_s17, %s1242_s29  ;;  %s1247_s18 = sshll.u32 %s1405_s16, 4  ;;  %s1248_s18 = int_to_ptr.vmem [resolvable:$false] %s1247_s18 }
  0x34   : > { %s1249_s30 = scalar_lea.vmem %s1248_s18, 256  ;;  %p1250_p9 = scmp.lt.s32.totalorder %s1553_s17, %s1248_s18 }
  0x35   : > { %p1245_p5 = pnand %p1243_p3, %p1562_p4  ;;  %p1251_p8 = scmp.lt.s32.totalorder %s1249_s30, %s1242_s29 }
  0x37   : > { %p1246_p11 = pneg %p1245_p5  ;;  %p1252_p7 = por %p1251_p8, %p1250_p9 }
  0x39   : > { %p1253_p10 = pnand %p1252_p7, %p1246_p11 }
  0x3b   : > { %1256 = shalt.err (!%p1253_p10)
}
  0x3c   : > { %1164 = dma.hbm_to_vmem [thread:$0]  (!%p1540_p0), %s1549_s20, 128, %s1553_s17, %s1556_s19  }
  0x3d   : > { %p1860_p12 = scmp.lt.s32.totalorder %s1403_s14, 3  ;;  %p1861_p1 = scmp.ge.s32.totalorder %s1403_s14, 1 }
  0x3e   : > { %s1598_s29 = scalar_lea.hbm %s1822_s0, %s1536_s27  ;;  %s330_s16 = scalar_lea.vmem [#allocation2], %s1533_s26 }
  0x3f   : > { %p1590_p2 = pnand %p1861_p1, %p1860_p12  ;;  %s338_s18 = sshll.u32 %s330_s16, 4  ;;  %s1601_s18 = int_to_ptr.vmem [resolvable:$true] %s338_s18 }
  0x40   : > { %s1607_s30 = scalar_lea.hbm %s1824_s2, %s1536_s27  ;;  %s1863_s1 = sand.u32 1, %s1391_s11  }
  0x41   : > { %s1862_s13 = scalar_select %p1590_p2, 1, 0 }
  0x42   : > { %s327_s14 = scalar_lea.sflag [#allocation3], %s1863_s1  ;;  %s1257_s9 = scalar_lea.hbm %s1598_s29, 128 }
  0x43   : > { %p1258_p8 = scmp.ne.s32.totalorder %s1598_s29, %s1257_s9  ;;  %s1262_s8 = scalar_lea.hbm %s1822_s0, 256 }
  0x44   : > { %p1263_p6 = scmp.lt.u32.totalorder %s1598_s29, %s1822_s0  ;;  %p1264_p13 = scmp.lt.u32.totalorder %s1262_s8, %s1257_s9 }
  0x45   : > { %p1260_p9 = pnand %p1258_p8, %p1562_p4  ;;  %p1266_p5 = scmp.lt.u32.totalorder %s1257_s9, %s1598_s29 }
  0x46   : > { %p1265_p3 = por %p1264_p13, %p1263_p6 }
  0x47   : > { %p1261_p11 = pneg %p1260_p9 }
  0x48   : > { %p1267_p7 = por %p1266_p5, %p1265_p3 }
  0x4a   : > { %p1268_p10 = pnand %p1267_p7, %p1261_p11 }
  0x4c   : > { %1271 = shalt.err (!%p1268_p10)
}
  0x4d   : > { %s1272_s1 = scalar_lea.vmem %s1601_s18, 128  ;;  %s1406_s27 = smov [#allocation2]  }
  0x4e   : > { %p1273_p12 = scmp.ne.s32.totalorder %s1601_s18, %s1272_s1  ;;  %s1277_s17 = sshll.u32 %s1406_s27, 4  ;;  %s1278_s17 = int_to_ptr.vmem [resolvable:$false] %s1277_s17 }
  0x4f   : > { %s1279_s7 = scalar_lea.vmem %s1278_s17, 256  ;;  %p1280_p9 = scmp.lt.s32.totalorder %s1601_s18, %s1278_s17 }
  0x50   : > { %p1275_p1 = pnand %p1273_p12, %p1562_p4  ;;  %p1281_p2 = scmp.lt.s32.totalorder %s1279_s7, %s1272_s1 }
  0x52   : > { %p1276_p8 = pneg %p1275_p1  ;;  %p1282_p6 = por %p1281_p2, %p1280_p9 }
  0x54   : > { %p1283_p13 = pnand %p1282_p6, %p1276_p8 }
  0x56   : > { %1286 = shalt.err (!%p1283_p13)
}
  0x57   : > { %1161 = dma.hbm_to_vmem [thread:$0]  (!%p1540_p0), %s1598_s29, 128, %s1601_s18, %s327_s14  }
  0x58   : > { %s371_s8 = scalar_lea.vmem [#allocation7], %s1533_s26  ;;  %s1287_s20 = scalar_lea.hbm %s1607_s30, 128 }
  0x59   : > { %s382_s9 = sshll.u32 %s371_s8, 4  ;;  %p1288_p11 = scmp.ne.s32.totalorder %s1607_s30, %s1287_s20  ;;  %s383_s9 = int_to_ptr.vmem [resolvable:$true] %s382_s9 }
  0x5a   : > { %s1292_s16 = scalar_lea.hbm %s1824_s2, 256  ;;  %p1293_p5 = scmp.lt.u32.totalorder %s1607_s30, %s1824_s2 }
  0x5b   : > { %p1290_p2 = pnand %p1288_p11, %p1562_p4  ;;  %p1294_p7 = scmp.lt.u32.totalorder %s1292_s16, %s1287_s20 }
  0x5c   : > { %p1296_p12 = scmp.lt.u32.totalorder %s1287_s20, %s1607_s30 }
  0x5d   : > { %p1291_p3 = pneg %p1290_p2  ;;  %p1295_p10 = por %p1294_p7, %p1293_p5 }
  0x5f   : > { %p1297_p1 = por %p1296_p12, %p1295_p10 }
  0x61   : > { %p1298_p8 = pnand %p1297_p1, %p1291_p3 }
  0x63   : > { %1301 = shalt.err (!%p1298_p8)
}
  0x64   : > { %s1302_s14 = scalar_lea.vmem %s383_s9, 128  ;;  %s1407_s26 = smov [#allocation7]  }
  0x65   : > { %p1303_p9 = scmp.ne.s32.totalorder %s383_s9, %s1302_s14  ;;  %s1307_s29 = sshll.u32 %s1407_s26, 4  ;;  %s1308_s29 = int_to_ptr.vmem [resolvable:$false] %s1307_s29 }
  0x66   : > { %s1309_s18 = scalar_lea.vmem %s1308_s29, 256  ;;  %p1310_p11 = scmp.lt.s32.totalorder %s383_s9, %s1308_s29 }
  0x67   : > { %p1305_p6 = pnand %p1303_p9, %p1562_p4  ;;  %p1311_p2 = scmp.lt.s32.totalorder %s1309_s18, %s1302_s14 }
  0x69   : > { %p1306_p13 = pneg %p1305_p6  ;;  %p1312_p0 = por %p1311_p2, %p1310_p11 }
  0x6b   : > { %p1313_p5 = pnand %p1312_p0, %p1306_p13 }
  0x6d   : > { %1316 = shalt.err (!%p1313_p5)
}
  0x6e   : > { %p1864_p7 = scmp.ne.s32.totalorder %s1857_s28, 0  ;;  %p1865_p3 = scmp.ne.s32.totalorder %s1862_s13, 0 }
  0x6f   : > { %s1654_s23 = sand.u32 (!%p1865_p3), 1, %s1387_s10   ;;  %p1866_p0 = scmp.ne.s32.totalorder (!%p1865_p3), %s1852_s21, 0 }
  0x70   : > { %1167 = dma.hbm_to_vmem [thread:$0]  (!%p1864_p7), %s1607_s30, 128, %s383_s9, %s1556_s19  }
  0x71   : > { %391 = sbr.rel (%p1865_p3) target bundleno = 903 (0x387), region = 56  ;;  %s1020_s17 = sshll.u32 (!%p1865_p3), %s1654_s23, 3 }
  0x72   : > { %s394_s7 = scalar_lea.sflag (!%p1865_p3), [#allocation3], %s1654_s23  ;;  %s397_s8 = scalar_lea.vmem (!%p1865_p3), [#allocation2], %s1020_s17 }
  0x78   : > { %1370 = dma.done.wait (%p1866_p0), %s394_s7, 128  }
  0x79   : > { %1372 = vsyncadd (%p1866_p0), %s394_s7, 4294967168  ;;  %s402_s28 = sand.u32 1, %s1493_s15  }
  0x7a   : > { %s403_s19 = scalar_lea.sflag [#allocation6], %s402_s28 }
  0x7b   : > { %1374 = dma.done.wait (%p1866_p0), %s403_s19, 256  }
  0x7c   : > { %1376 = vsyncadd (%p1866_p0), %s403_s19, 4294967040  ;;  %v1408_v0 = vmov 0.0|0.0   ;;  %vm1409_vm0 = vmmov 0   ;;  %v1410_v1 = vmov 0.0   ;;  %v503_v2 = vld [vmem:[%s1825_s3] sm:$0xff]  ;;  %v504_v3 = vld [vmem:[%s1825_s3 + $0x8] sm:$0xff] }
  0x7d   : > { %1120 = vmatprep.subr.bf16.mxu0 %v1408_v0  ;;  %1126 = vmatprep.subr.bf16.mxu1 %v1408_v0  ;;  %v1024_v4 = vld [vmem:[%s1825_s3 + $0x20] sm:$0xff]  ;;  %v1121_v5 = vpack.c.bf16 %v504_v3, %v503_v2  ;;  %v1025_v6 = vld [vmem:[%s1825_s3 + $0x28] sm:$0xff]  ;;  %v505_v7 = vld [vmem:[%s1825_s3 + $0x10] sm:$0xff]  ;;  %v496_v14 = vrot.slane %v1410_v1, 7  ;;  %vm501_vm1 = vcmask 1040384   ;;  %vm507_vm2 = vcmask 261120  }
  0x7e   : > { %1076 = vmatprep.mubr.msk.f32.mxu0 %vm1409_vm0, %v1410_v1  ;;  %1087 = vmatprep.mubr.msk.f32.mxu1 %vm1409_vm0, %v1410_v1  ;;  %v506_v8 = vld [vmem:[%s1825_s3 + $0x18] sm:$0xff]  ;;  %v1127_v9 = vpack.c.bf16 %v1025_v6, %v1024_v4  ;;  %v1026_v10 = vld [vmem:[%s1825_s3 + $0x30] sm:$0xff]  ;;  %v1697_v12 = vld [vmem:[%s397_s8] sm:$0xff]  ;;  %v656_v25 = vrot.slane %v1410_v1, 1  ;;  %vm658_vm3 = vcmask 1046528   ;;  %vm763_vm4 = vcmask 523264  }
  0x7f   : > { %v1027_v11 = vld [vmem:[%s1825_s3 + $0x38] sm:$0xff]  ;;  %1122 = vmatpush3.bf16.msra.mxu0 %v1121_v5  ;;  %v1124_v13 = vpack.c.bf16 %v506_v8, %v505_v7  ;;  %v499_v15 = vrot.slane %v1697_v12, 7  ;;  %v1030_v17 = vld [vmem:[%s1825_s3 + $0x40] sm:$0xff]  ;;  %v1031_v18 = vld [vmem:[%s1825_s3 + $0x48] sm:$0xff]  ;;  %v653_v24 = vrot.slane %v1697_v12, 1  ;;  %s1867_s16 = sld [smem:[#allocation19_spill]] }
  0x80   : > { %1128 = vmatpush3.bf16.msra.mxu1 %v1127_v9  ;;  %1123 = vmatprep.subr.bf16.mxu0 %v1408_v0  ;;  %v1130_v16 = vpack.c.bf16 %v1027_v11, %v1026_v10  ;;  %v1133_v20 = vpack.c.bf16 %v1031_v18, %v1030_v17  ;;  %v1032_v21 = vld [vmem:[%s1825_s3 + $0x50] sm:$0xff]  ;;  %v1033_v22 = vld [vmem:[%s1825_s3 + $0x58] sm:$0xff]  ;;  %v748_v27 = vld [vmem:[%s1827_s5] sm:$0xff]  ;;  %s1868_s14 = sld [smem:[#allocation20_spill]]  ;;  %s1041_s26 = sshll.u32 %s1395_s12, 7 }
  0x81   : > { %1129 = vmatprep.subr.bf16.mxu1 %v1408_v0  ;;  %v502_v19 = vsel %vm501_vm1, %v496_v14, %v499_v15  ;;  %v1136_v23 = vpack.c.bf16 %v1033_v22, %v1032_v21  ;;  %v659_v26 = vsel %vm658_vm3, %v653_v24, %v656_v25  ;;  %v749_v28 = vld [vmem:[%s1827_s5 + $0x8] sm:$0xff]  ;;  %v750_v30 = vld [vmem:[%s1827_s5 + $0x10] sm:$0xff]  ;;  %v751_v31 = vld [vmem:[%s1827_s5 + $0x18] sm:$0xff]  ;;  %s459_s29 = scalar_lea.vmem [#allocation8], %s1020_s17  ;;  %s1869_s19 = sld [smem:[#allocation21_spill]] }
  0x82   : > { %v1139_v29 = vpack.c.bf16 %v749_v28, %v748_v27  ;;  %v1142_v32 = vpack.c.bf16 %v751_v31, %v750_v30  ;;  %v752_v33 = vld [vmem:[%s1827_s5 + $0x20] sm:$0xff]  ;;  %v753_v34 = vld [vmem:[%s1827_s5 + $0x28] sm:$0xff]  ;;  %v754_v36 = vld [vmem:[%s1827_s5 + $0x30] sm:$0xff]  ;;  %s884_s18 = sshll.u32 %s459_s29, 4  ;;  %s870_s30 = scalar_lea.sflag [#allocation4], %s1654_s23  ;;  %s1774_s18 = int_to_ptr.vmem [resolvable:$true] %s884_s18 }
  0x83   : > { %1125 = vmatpush3.bf16.msra.mxu0 %v1124_v13  ;;  %v1145_v35 = vpack.c.bf16 %v753_v34, %v752_v33  ;;  %v755_v37 = vld [vmem:[%s1827_s5 + $0x38] sm:$0xff]  ;;  %v1035_v45 = vld [vmem:[%s1826_s4] ss:$0 sm:$0xff]  ;;  %s1317_s8 = scalar_lea.vmem %s1774_s18, 128  ;;  %p1870_p10 = scmp.ne.s32.totalorder %s1853_s22, 0 }
  0x84   : > { %1131 = vmatpush3.bf16.msra.mxu1 %v1130_v16  ;;  %1132 = vmatprep.subr.bf16.mxu0 %v1408_v0  ;;  %v1148_v38 = vpack.c.bf16 %v755_v37, %v754_v36  ;;  %v1036_v50 = vld [vmem:[%s1828_s6] ss:$0 sm:$0xff]  ;;  %p1318_p4 = scmp.ne.s32.totalorder %s1774_s18, %s1317_s8  ;;  %s1411_s12 = smov [#allocation8]  }
  0x85   : > { %1138 = vmatprep.subr.bf16.mxu1 %v1408_v0  ;;  %s1321_s17 = sshll.u32 %s1411_s12, 4  ;;  %s1322_s17 = int_to_ptr.vmem [resolvable:$false] %s1321_s17 }
  0x86   : > { %1077 = vmatmul.mubr.msk.f32.vlgmr.msra.gmra.mrb[0].mxu0 %vm507_vm2, %v502_v19  ;;  %v1039_v3 = vld [vmem:[%s1868_s14] ss:$0 sm:$0xff]  ;;  %p1319_p12 = pnand %p1318_p4, %p1870_p10  ;;  %s1323_s15 = scalar_lea.vmem %s1322_s17, 256 }
  0x87   : > { %1088 = vmatmul.mubr.msk.f32.vlgmr.msra.gmra.mrb[0].mxu1 %vm507_vm2, %v1697_v12  ;;  %1134 = vmatpush3.bf16.msra.mxu0 %v1133_v20  ;;  %s1772_s13 = scalar_lea.hbm %s1869_s19, %s1041_s26  ;;  %p1324_p8 = scmp.lt.s32.totalorder %s1774_s18, %s1322_s17 }
  0x88   : > { %1135 = vmatprep.subr.bf16.mxu0 %v1408_v0  ;;  %1098 = vmatprep.mubr.msk.f32.mxu0 %vm1409_vm0, %v1410_v1  ;;  %p1320_p1 = pneg %p1319_p12  ;;  %p1325_p9 = scmp.lt.s32.totalorder %s1323_s15, %s1317_s8 }
  0x89   : > { %1117 = vmatprep.mubr.msk.f32.mxu1 %vm1409_vm0, %v1410_v1  ;;  %1140 = vmatpush3.bf16.msra.mxu1 %v1139_v29  ;;  %v1038_v1 = vld [vmem:[%s1867_s16] ss:$0 sm:$0xff] }
  0x8a   : > { %1141 = vmatprep.subr.bf16.mxu1 %v1408_v0  ;;  %p1326_p6 = por %p1325_p9, %p1324_p8 }
  0x8b   : > { %1137 = vmatpush3.bf16.msra.mxu0 %v1136_v23 }
  0x8c   : > { %p1327_p13 = pnand %p1326_p6, %p1320_p1 }
  0x8d   : > { %1143 = vmatpush3.bf16.msra.mxu1 %v1142_v32 }
  0x8e   : > { %1099 = vmatmul.mubr.msk.f32.vlgmr.msra.gmra.mrb[2].mxu0 %vm507_vm2, %v659_v26  ;;  %1144 = vmatprep.subr.bf16.mxu1 %v1408_v0 }
  0x91   : > { %1146 = vmatpush3.bf16.msra.mxu1 %v1145_v35 }
  0x92   : > { %1147 = vmatprep.subr.bf16.mxu1 %v1408_v0 }
  0x95   : > { %1149 = vmatpush3.bf16.msra.mxu1 %v1148_v38 }
 0x159   : > { %v577_v39 = vpop.f32.mrb[0].mxu0 }
 0x15a   : > { %v1078_v40 = vpop.f32.mrb[1].mxu0  ;;  %v649_v41 = vpop.f32.mrb[0].mxu1 }
 0x15b   : > { %v650_v42 = vadd.f32 %v649_v41, %v577_v39  ;;  %v1089_v43 = vpop.f32.mrb[1].mxu1 }
 0x161   : > { %v734_v44 = vpop.f32.mrb[2].mxu0 }
 0x162   : > { %v738_v46 = vadd.f32 %v734_v44, %v650_v42  ;;  %v1100_v47 = vpop.f32.mrb[3].mxu0 }
 0x164   : > { %v746_v48 = vadd.f32 %v1035_v45, %v738_v46 }
 0x166   : > { %v747_v49 = vmax.f32 %v746_v48, 0.0 }
 0x168   : > { %1118 = vmatmul.mubr.msk.f32.vlgmr.msra.gmra.mrb[2].mxu1 %vm763_vm4, %v747_v49 }
 0x23b   : > { %v833_v51 = vpop.f32.mrb[2].mxu1 }
 0x23c   : > { %v834_v52 = vadd.f32 %v1036_v50, %v833_v51  ;;  %v1119_v53 = vpop.f32.mrb[3].mxu1 }
 0x23e   : > { %v837_v54 = vadd.f32 %v834_v52, %v1697_v12 }
 0x240   : > { %v838_v55 = vsel %vm507_vm2, %v837_v54, 0.0 }
 0x241   : > { %839 = vadd.xlane.f32.xlu0 %v838_v55 }
 0x2ce   : > { %v840_v56 = vpop.xlane.xlu0 %839 }
 0x2cf   : > { %v842_v57 = vmul.f32 0.03125, %v840_v56 }
 0x2d1   : > { %v843_v58 = vsub.f32 %v837_v54, %v842_v57 }
 0x2d3   : > { %v844_v59 = vmul.f32 %v843_v58, %v843_v58 }
 0x2d5   : > { %v845_v60 = vsel %vm507_vm2, %v844_v59, 0.0 }
 0x2d6   : > { %846 = vadd.xlane.f32.xlu0 %v845_v60 }
 0x363   : > { %v847_v61 = vpop.xlane.xlu0 %846 }
 0x364   : > { %v848_v62 = vmul.f32 0.03125, %v847_v61 }
 0x366   : > { %v849_v63 = vadd.f32 1e-05, %v848_v62 }
 0x368   : > { %1225 = vrsqrt.f32 %v849_v63 }
 0x372   : > { %v1226_v0 = vpop.eup %1225 }
 0x373   : > { %v851_v2 = vmul.f32 %v1226_v0, %v843_v58 }
 0x375   : > { %v859_v4 = vmul.f32 %v1038_v1, %v851_v2 }
 0x377   : > { %v867_v5 = vadd.f32 %v1039_v3, %v859_v4 }
 0x379   : > { %868 = vst.msk [vmem:[%s459_s29] sm:$0xff] %vm507_vm2, %v867_v5 }
 0x37a   : > { %1330 = shalt.err (!%p1327_p13)
}
 0x37b   : > { %s1331_s23 = scalar_lea.hbm %s1772_s13, 128  ;;  %s1335_s20 = scalar_lea.hbm %s1869_s19, 256 }
 0x37c   : > { %p1332_p11 = scmp.ne.s32.totalorder %s1772_s13, %s1331_s23  ;;  %p1336_p7 = scmp.lt.u32.totalorder %s1772_s13, %s1869_s19 }
 0x37d   : > { %p1337_p3 = scmp.lt.u32.totalorder %s1335_s20, %s1331_s23  ;;  %p1339_p4 = scmp.lt.u32.totalorder %s1331_s23, %s1772_s13 }
 0x37e   : > { %p1333_p2 = pnand %p1332_p11, %p1870_p10 }
 0x37f   : > { %p1338_p0 = por %p1337_p3, %p1336_p7 }
 0x380   : > { %p1334_p5 = pneg %p1333_p2 }
 0x381   : > { %p1340_p12 = por %p1339_p4, %p1338_p0 }
 0x383   : > { %p1341_p1 = pnand %p1340_p12, %p1334_p5 }
 0x385   : > { %1344 = shalt.err (!%p1341_p1)
}
 0x386   : > { %1156 = dma.vmem_to_hbm [thread:$0]  (%p1870_p10), %s1774_s18, 128, %s1772_s13, %s870_s30  }
 0x387 PF: > { %s1871_s16 = sld [smem:[#allocation12_spill]]  ;;  %s1872_s1 = sld [smem:[#allocation17_spill]] }
 0x388   : > { %s1873_s27 = sld [smem:[#allocation14_spill]] }
 0x38d   : > { %s896_s14 = sand.u32 1, %s1871_s16   ;;  %p1874_p8 = scmp.ne.s32.totalorder %s1872_s1, 0 }
 0x38e   : > { %p1875_p9 = scmp.ge.s32.totalorder %s1873_s27, 2  ;;  %s897_s26 = scalar_lea.sflag [#allocation4], %s896_s14 }
 0x390   : > { %p1169_p6 = pnand %p1875_p9, %p1874_p8 }
 0x392   : > { %1378 = dma.done.wait (!%p1169_p6), %s897_s26, 128  }
 0x393   : > { %1380 = vsyncadd (!%p1169_p6), %s897_s26, 4294967168  ;;  %s28_s14 = sadd.s32 1, %s1873_s27   ;;  %s1876_s22 = sld [smem:[#allocation16_spill]] }
 0x394   : > { %p25_p13 = scmp.ge.s32.totalorder %s28_s14, 4   ;;  %s1877_s12 = sld [smem:[#allocation13_spill]] }
 0x395   : > { %s1878_s13 = sld [smem:[#allocation15_spill]]  ;;  %s1879_s30 = smov %s1387_s10 }
 0x396   : > { %s1880_s10 = smov %s1391_s11  ;;  %27 = sbr.rel (!%p25_p13) target bundleno = 13 (0xd), region = 127 }
 0x399   : > { %s1881_s11 = smov %s1876_s22 }
 0x39d   :  { %902 = vsyncpa [#allocation3], 1 }
 0x39e   :  { %904 = vsyncpa [#allocation3 + $0x1], 1 }
 0x39f   :  { %905 = vsyncpa [#allocation6], 1 }
 0x3a0   :  { %907 = vsyncpa [#allocation6 + $0x1], 1 }
 0x3a1   :  { %908 = vsyncpa [#allocation4], 1 }
 0x3a2   :  { %910 = vsyncpa [#allocation4 + $0x1], 1 }

// kernel: tpu_custom_call.1
= control target key start
LH: loop header
LB: loop body
LE: loop exit
PB: predicated region body
PF: predicated region fallthrough
CT: control target
= control target key end

     0   :  { %s1822_s0 = inlined_call_operand.hbm [shape: f32[2,8,32], index: 0, kind: input, shape index: {}]   ;;  %s1823_s1 = inlined_call_operand.hbm [shape: f32[2,8,32], index: 1, kind: input, shape index: {}]   ;;  %s1824_s2 = inlined_call_operand.hbm [shape: f32[2,8,32], index: 2, kind: input, shape index: {}]   ;;  %s1825_s3 = inlined_call_operand.vmem [shape: f32[3,32,64], index: 3, kind: input, shape index: {}]   ;;  %s1826_s4 = inlined_call_operand.vmem [shape: f32[1,64], index: 4, kind: input, shape index: {}]   ;;  %s1827_s5 = inlined_call_operand.vmem [shape: f32[64,32], index: 5, kind: input, shape index: {}]   ;;  %s1828_s6 = inlined_call_operand.vmem [shape: f32[1,32], index: 6, kind: input, shape index: {}]   ;;  %s1829_s7 = inlined_call_operand.vmem [shape: f32[1,32], index: 7, kind: input, shape index: {}]   ;;  %s1830_s8 = inlined_call_operand.vmem [shape: f32[1,32], index: 8, kind: input, shape index: {}]   ;;  %s1831_s9 = inlined_call_operand.hbm [shape: f32[2,8,32], index: 9, kind: output, shape index: {}]  }
   0x1   :  { %1843 = sst [smem:[#allocation18_spill]] %s1823_s1 }
   0x2   :  { %1844 = sst [smem:[#allocation19_spill]] %s1829_s7 }
   0x3   :  { %1845 = sst [smem:[#allocation20_spill]] %s1830_s8 }
   0x4   :  { %1846 = sst [smem:[#allocation21_spill]] %s1831_s9 }
   0x5   :  { %14 = vsyncpa [#allocation3], 0 }
   0x6   :  { %16 = vsyncpa [#allocation3 + $0x1], 0 }
   0x7   :  { %17 = vsyncpa [#allocation6], 0 }
   0x8   :  { %19 = vsyncpa [#allocation6 + $0x1], 0 }
   0x9   :  { %20 = vsyncpa [#allocation4], 0 }
   0xa   :  { %22 = vsyncpa [#allocation4 + $0x1], 0  ;;  %s1462_s30 = smov 0   ;;  %s1464_s10 = smov 0  }
   0xb   :  { %s1466_s11 = smov 0   ;;  %s1468_s12 = smov 0  }
   0xc   :  { %s1470_s13 = smov 0   ;;  %s1472_s14 = smov 0  }
   0xd LB: > { %1847 = sst [smem:[#allocation12_spill]] %s1383_s30  ;;  %s1493_s15 = sadd.s32 4294967295, %s1403_s14   ;;  %s1403_s14 = sphi %s1472_s14, %s28_s14   ;;  %s1399_s13 = sphi %s1470_s13, %s1878_s13   ;;  %s1395_s12 = sphi %s1468_s12, %s1877_s12   ;;  %s1391_s11 = sphi %s1466_s11, %s1881_s11   ;;  %s1387_s10 = sphi %s1464_s10, %s1880_s10   ;;  %s1383_s30 = sphi %s1462_s30, %s1879_s30  }
   0xe   : > { %1848 = sst [smem:[#allocation13_spill]] %s1399_s13  ;;  %s1010_s16 = sadd.s32 4294967294, %s1403_s14  }
   0xf   : > { %1849 = sst [smem:[#allocation14_spill]] %s1403_s14  ;;  %s40_s17 = sadd.s32 1, %s1399_s13 }
  0x10   : > { %s49_s18 = sadd.s32 1, %s1391_s11  ;;  %p42_p0 = scmp.ge.s32.totalorder %s40_s17, 2 }
  0x11   : > { %p56_p1 = scmp.ne.s32.totalorder %s1391_s11, %s1387_s10  ;;  %p57_p2 = scmp.eq.s32.totalorder %s1403_s14, 0 }
  0x12   : > { %p62_p3 = scmp.ne.s32.totalorder %s1387_s10, %s1383_s30  ;;  %s1883_s17 = smov (%p42_p0, %s40_s17), 0 }
  0x13   : > { %1850 = sst [smem:[#allocation15_spill]] %s1883_s17  ;;  %p1505_p4 = por %p57_p2, %p56_p1 }
  0x14   : > { %p63_p5 = scmp.eq.s32.totalorder %s1493_s15, 0  ;;  %s44_s20 = ssub.s32 %s1399_s13, %s1883_s17 }
  0x15   : > { %p282_p6 = scmp.eq.s32.totalorder %s1493_s15, 1  ;;  %p47_p7 = scmp.eq.s32.totalorder %s44_s20, 0 }
  0x16   : > { %p1513_p8 = por %p63_p5, %p62_p3  ;;  %p288_p10 = scmp.eq.s32.totalorder %s1010_s16, 1 }
  0x17   : > { %p1517_p9 = por %p282_p6, %p56_p1  ;;  %p1172_p13 = scmp.lt.s32.totalorder %s1403_s14, 2 }
  0x18   : > { %s1852_s21 = scalar_select %p1513_p8, 1, 0 }
  0x19   : > { %s1853_s22 = scalar_select %p1517_p9, 1, 0 }
  0x1a   : > { %s1522_s23 = scalar_select %p47_p7, %s1391_s11, %s49_s18  }
  0x1b   : > { %p1524_p11 = por %p288_p10, %p62_p3  ;;  %s1832_s25 = sand.u32 1, %s1391_s11  }
  0x1c   : > { %1854 = sst [smem:[#allocation16_spill]] %s1522_s23  ;;  %s1533_s26 = sshll.u32 %s1832_s25, 3 }
  0x1d   : > { %s1855_s24 = scalar_select %p1524_p11, 1, 0 }
  0x1e   : > { %s1536_s27 = sshll.u32 %s1399_s13, 7  ;;  %p1540_p0 = pnand %p1172_p13, %p1505_p4 }
  0x1f   : > { %1856 = sst [smem:[#allocation17_spill]] %s1855_s24  ;;  %s345_s29 = sand.u32 1, %s1403_s14  }
  0x20   : > { %s1857_s28 = scalar_select %p1540_p0, 1, 0 }
  0x21   : > { %s1858_s1 = sld [smem:[#allocation18_spill]]  ;;  %s349_s25 = scalar_lea.vmem [#allocation5], %s1533_s26 }
  0x22   : > { %s360_s17 = sshll.u32 %s349_s25, 4  ;;  %s1556_s19 = scalar_lea.sflag [#allocation6], %s345_s29  ;;  %s1553_s17 = int_to_ptr.vmem [resolvable:$true] %s360_s17 }
  0x23   : > { %p1562_p4 = pneg %p1540_p0 }
  0x27   : > { %s1549_s20 = scalar_lea.hbm %s1858_s1, %s1536_s27  ;;  %s1232_s25 = scalar_lea.hbm %s1858_s1, 256 }
  0x28   : > { %s1227_s13 = scalar_lea.hbm %s1549_s20, 128  ;;  %p1233_p7 = scmp.lt.u32.totalorder %s1549_s20, %s1858_s1 }
  0x29   : > { %p1228_p3 = scmp.ne.s32.totalorder %s1549_s20, %s1227_s13  ;;  %p1234_p10 = scmp.lt.u32.totalorder %s1232_s25, %s1227_s13 }
  0x2a   : > { %p1236_p12 = scmp.lt.u32.totalorder %s1227_s13, %s1549_s20 }
  0x2b   : > { %p1230_p5 = pnand %p1562_p4, %p1228_p3  ;;  %p1235_p13 = por %p1234_p10, %p1233_p7 }
  0x2d   : > { %p1231_p6 = pneg %p1230_p5  ;;  %p1237_p1 = por %p1236_p12, %p1235_p13 }
  0x2f   : > { %p1238_p2 = pnand %p1237_p1, %p1231_p6 }
  0x31   : > { %1241 = shalt.err (!%p1238_p2)
}
  0x32   : > { %s1242_s29 = scalar_lea.vmem %s1553_s17, 128  ;;  %s1405_s16 = smov [#allocation5]  }
  0x33   : > { %p1243_p3 = scmp.ne.s32.totalorder %s1553_s17, %s1242_s29  ;;  %s1247_s18 = sshll.u32 %s1405_s16, 4  ;;  %s1248_s18 = int_to_ptr.vmem [resolvable:$false] %s1247_s18 }
  0x34   : > { %s1249_s30 = scalar_lea.vmem %s1248_s18, 256  ;;  %p1250_p9 = scmp.lt.s32.totalorder %s1553_s17, %s1248_s18 }
  0x35   : > { %p1245_p5 = pnand %p1243_p3, %p1562_p4  ;;  %p1251_p8 = scmp.lt.s32.totalorder %s1249_s30, %s1242_s29 }
  0x37   : > { %p1246_p11 = pneg %p1245_p5  ;;  %p1252_p7 = por %p1251_p8, %p1250_p9 }
  0x39   : > { %p1253_p10 = pnand %p1252_p7, %p1246_p11 }
  0x3b   : > { %1256 = shalt.err (!%p1253_p10)
}
  0x3c   : > { %1164 = dma.hbm_to_vmem [thread:$0]  (!%p1540_p0), %s1549_s20, 128, %s1553_s17, %s1556_s19  }
  0x3d   : > { %p1860_p12 = scmp.lt.s32.totalorder %s1403_s14, 3  ;;  %p1861_p1 = scmp.ge.s32.totalorder %s1403_s14, 1 }
  0x3e   : > { %s1598_s29 = scalar_lea.hbm %s1822_s0, %s1536_s27  ;;  %s330_s16 = scalar_lea.vmem [#allocation2], %s1533_s26 }
  0x3f   : > { %p1590_p2 = pnand %p1861_p1, %p1860_p12  ;;  %s338_s18 = sshll.u32 %s330_s16, 4  ;;  %s1601_s18 = int_to_ptr.vmem [resolvable:$true] %s338_s18 }
  0x40   : > { %s1607_s30 = scalar_lea.hbm %s1824_s2, %s1536_s27  ;;  %s1863_s1 = sand.u32 1, %s1391_s11  }
  0x41   : > { %s1862_s13 = scalar_select %p1590_p2, 1, 0 }
  0x42   : > { %s327_s14 = scalar_lea.sflag [#allocation3], %s1863_s1  ;;  %s1257_s9 = scalar_lea.hbm %s1598_s29, 128 }
  0x43   : > { %p1258_p8 = scmp.ne.s32.totalorder %s1598_s29, %s1257_s9  ;;  %s1262_s8 = scalar_lea.hbm %s1822_s0, 256 }
  0x44   : > { %p1263_p6 = scmp.lt.u32.totalorder %s1598_s29, %s1822_s0  ;;  %p1264_p13 = scmp.lt.u32.totalorder %s1262_s8, %s1257_s9 }
  0x45   : > { %p1260_p9 = pnand %p1258_p8, %p1562_p4  ;;  %p1266_p5 = scmp.lt.u32.totalorder %s1257_s9, %s1598_s29 }
  0x46   : > { %p1265_p3 = por %p1264_p13, %p1263_p6 }
  0x47   : > { %p1261_p11 = pneg %p1260_p9 }
  0x48   : > { %p1267_p7 = por %p1266_p5, %p1265_p3 }
  0x4a   : > { %p1268_p10 = pnand %p1267_p7, %p1261_p11 }
  0x4c   : > { %1271 = shalt.err (!%p1268_p10)
}
  0x4d   : > { %s1272_s1 = scalar_lea.vmem %s1601_s18, 128  ;;  %s1406_s27 = smov [#allocation2]  }
  0x4e   : > { %p1273_p12 = scmp.ne.s32.totalorder %s1601_s18, %s1272_s1  ;;  %s1277_s17 = sshll.u32 %s1406_s27, 4  ;;  %s1278_s17 = int_to_ptr.vmem [resolvable:$false] %s1277_s17 }
  0x4f   : > { %s1279_s7 = scalar_lea.vmem %s1278_s17, 256  ;;  %p1280_p9 = scmp.lt.s32.totalorder %s1601_s18, %s1278_s17 }
  0x50   : > { %p1275_p1 = pnand %p1273_p12, %p1562_p4  ;;  %p1281_p2 = scmp.lt.s32.totalorder %s1279_s7, %s1272_s1 }
  0x52   : > { %p1276_p8 = pneg %p1275_p1  ;;  %p1282_p6 = por %p1281_p2, %p1280_p9 }
  0x54   : > { %p1283_p13 = pnand %p1282_p6, %p1276_p8 }
  0x56   : > { %1286 = shalt.err (!%p1283_p13)
}
  0x57   : > { %1161 = dma.hbm_to_vmem [thread:$0]  (!%p1540_p0), %s1598_s29, 128, %s1601_s18, %s327_s14  }
  0x58   : > { %s371_s8 = scalar_lea.vmem [#allocation7], %s1533_s26  ;;  %s1287_s20 = scalar_lea.hbm %s1607_s30, 128 }
  0x59   : > { %s382_s9 = sshll.u32 %s371_s8, 4  ;;  %p1288_p11 = scmp.ne.s32.totalorder %s1607_s30, %s1287_s20  ;;  %s383_s9 = int_to_ptr.vmem [resolvable:$true] %s382_s9 }
  0x5a   : > { %s1292_s16 = scalar_lea.hbm %s1824_s2, 256  ;;  %p1293_p5 = scmp.lt.u32.totalorder %s1607_s30, %s1824_s2 }
  0x5b   : > { %p1290_p2 = pnand %p1288_p11, %p1562_p4  ;;  %p1294_p7 = scmp.lt.u32.totalorder %s1292_s16, %s1287_s20 }
  0x5c   : > { %p1296_p12 = scmp.lt.u32.totalorder %s1287_s20, %s1607_s30 }
  0x5d   : > { %p1291_p3 = pneg %p1290_p2  ;;  %p1295_p10 = por %p1294_p7, %p1293_p5 }
  0x5f   : > { %p1297_p1 = por %p1296_p12, %p1295_p10 }
  0x61   : > { %p1298_p8 = pnand %p1297_p1, %p1291_p3 }
  0x63   : > { %1301 = shalt.err (!%p1298_p8)
}
  0x64   : > { %s1302_s14 = scalar_lea.vmem %s383_s9, 128  ;;  %s1407_s26 = smov [#allocation7]  }
  0x65   : > { %p1303_p9 = scmp.ne.s32.totalorder %s383_s9, %s1302_s14  ;;  %s1307_s29 = sshll.u32 %s1407_s26, 4  ;;  %s1308_s29 = int_to_ptr.vmem [resolvable:$false] %s1307_s29 }
  0x66   : > { %s1309_s18 = scalar_lea.vmem %s1308_s29, 256  ;;  %p1310_p11 = scmp.lt.s32.totalorder %s383_s9, %s1308_s29 }
  0x67   : > { %p1305_p6 = pnand %p1303_p9, %p1562_p4  ;;  %p1311_p2 = scmp.lt.s32.totalorder %s1309_s18, %s1302_s14 }
  0x69   : > { %p1306_p13 = pneg %p1305_p6  ;;  %p1312_p0 = por %p1311_p2, %p1310_p11 }
  0x6b   : > { %p1313_p5 = pnand %p1312_p0, %p1306_p13 }
  0x6d   : > { %1316 = shalt.err (!%p1313_p5)
}
  0x6e   : > { %p1864_p7 = scmp.ne.s32.totalorder %s1857_s28, 0  ;;  %p1865_p3 = scmp.ne.s32.totalorder %s1862_s13, 0 }
  0x6f   : > { %s1654_s23 = sand.u32 (!%p1865_p3), 1, %s1387_s10   ;;  %p1866_p0 = scmp.ne.s32.totalorder (!%p1865_p3), %s1852_s21, 0 }
  0x70   : > { %1167 = dma.hbm_to_vmem [thread:$0]  (!%p1864_p7), %s1607_s30, 128, %s383_s9, %s1556_s19  }
  0x71   : > { %391 = sbr.rel (%p1865_p3) target bundleno = 903 (0x387), region = 56  ;;  %s1020_s17 = sshll.u32 (!%p1865_p3), %s1654_s23, 3 }
  0x72   : > { %s394_s7 = scalar_lea.sflag (!%p1865_p3), [#allocation3], %s1654_s23  ;;  %s397_s8 = scalar_lea.vmem (!%p1865_p3), [#allocation2], %s1020_s17 }
  0x78   : > { %1370 = dma.done.wait (%p1866_p0), %s394_s7, 128  }
  0x79   : > { %1372 = vsyncadd (%p1866_p0), %s394_s7, 4294967168  ;;  %s402_s28 = sand.u32 1, %s1493_s15  }
  0x7a   : > { %s403_s19 = scalar_lea.sflag [#allocation6], %s402_s28 }
  0x7b   : > { %1374 = dma.done.wait (%p1866_p0), %s403_s19, 256  }
  0x7c   : > { %1376 = vsyncadd (%p1866_p0), %s403_s19, 4294967040  ;;  %v1408_v0 = vmov 0.0|0.0   ;;  %vm1409_vm0 = vmmov 0   ;;  %v1410_v1 = vmov 0.0   ;;  %v503_v2 = vld [vmem:[%s1825_s3] sm:$0xff]  ;;  %v504_v3 = vld [vmem:[%s1825_s3 + $0x8] sm:$0xff] }
  0x7d   : > { %1120 = vmatprep.subr.bf16.mxu0 %v1408_v0  ;;  %1126 = vmatprep.subr.bf16.mxu1 %v1408_v0  ;;  %v1024_v4 = vld [vmem:[%s1825_s3 + $0x20] sm:$0xff]  ;;  %v1121_v5 = vpack.c.bf16 %v504_v3, %v503_v2  ;;  %v1025_v6 = vld [vmem:[%s1825_s3 + $0x28] sm:$0xff]  ;;  %v505_v7 = vld [vmem:[%s1825_s3 + $0x10] sm:$0xff]  ;;  %v496_v14 = vrot.slane %v1410_v1, 7  ;;  %vm501_vm1 = vcmask 1040384   ;;  %vm507_vm2 = vcmask 261120  }
  0x7e   : > { %1076 = vmatprep.mubr.msk.f32.mxu0 %vm1409_vm0, %v1410_v1  ;;  %1087 = vmatprep.mubr.msk.f32.mxu1 %vm1409_vm0, %v1410_v1  ;;  %v506_v8 = vld [vmem:[%s1825_s3 + $0x18] sm:$0xff]  ;;  %v1127_v9 = vpack.c.bf16 %v1025_v6, %v1024_v4  ;;  %v1026_v10 = vld [vmem:[%s1825_s3 + $0x30] sm:$0xff]  ;;  %v1697_v12 = vld [vmem:[%s397_s8] sm:$0xff]  ;;  %v656_v25 = vrot.slane %v1410_v1, 1  ;;  %vm658_vm3 = vcmask 1046528   ;;  %vm763_vm4 = vcmask 523264  }
  0x7f   : > { %v1027_v11 = vld [vmem:[%s1825_s3 + $0x38] sm:$0xff]  ;;  %1122 = vmatpush3.bf16.msra.mxu0 %v1121_v5  ;;  %v1124_v13 = vpack.c.bf16 %v506_v8, %v505_v7  ;;  %v499_v15 = vrot.slane %v1697_v12, 7  ;;  %v1030_v17 = vld [vmem:[%s1825_s3 + $0x40] sm:$0xff]  ;;  %v1031_v18 = vld [vmem:[%s1825_s3 + $0x48] sm:$0xff]  ;;  %v653_v24 = vrot.slane %v1697_v12, 1  ;;  %s1867_s16 = sld [smem:[#allocation19_spill]] }
  0x80   : > { %1128 = vmatpush3.bf16.msra.mxu1 %v1127_v9  ;;  %1123 = vmatprep.subr.bf16.mxu0 %v1408_v0  ;;  %v1130_v16 = vpack.c.bf16 %v1027_v11, %v1026_v10  ;;  %v1133_v20 = vpack.c.bf16 %v1031_v18, %v1030_v17  ;;  %v1032_v21 = vld [vmem:[%s1825_s3 + $0x50] sm:$0xff]  ;;  %v1033_v22 = vld [vmem:[%s1825_s3 + $0x58] sm:$0xff]  ;;  %v748_v27 = vld [vmem:[%s1827_s5] sm:$0xff]  ;;  %s1868_s14 = sld [smem:[#allocation20_spill]]  ;;  %s1041_s26 = sshll.u32 %s1395_s12, 7 }
  0x81   : > { %1129 = vmatprep.subr.bf16.mxu1 %v1408_v0  ;;  %v502_v19 = vsel %vm501_vm1, %v496_v14, %v499_v15  ;;  %v1136_v23 = vpack.c.bf16 %v1033_v22, %v1032_v21  ;;  %v659_v26 = vsel %vm658_vm3, %v653_v24, %v656_v25  ;;  %v749_v28 = vld [vmem:[%s1827_s5 + $0x8] sm:$0xff]  ;;  %v750_v30 = vld [vmem:[%s1827_s5 + $0x10] sm:$0xff]  ;;  %v751_v31 = vld [vmem:[%s1827_s5 + $0x18] sm:$0xff]  ;;  %s459_s29 = scalar_lea.vmem [#allocation8], %s1020_s17  ;;  %s1869_s19 = sld [smem:[#allocation21_spill]] }
  0x82   : > { %v1139_v29 = vpack.c.bf16 %v749_v28, %v748_v27  ;;  %v1142_v32 = vpack.c.bf16 %v751_v31, %v750_v30  ;;  %v752_v33 = vld [vmem:[%s1827_s5 + $0x20] sm:$0xff]  ;;  %v753_v34 = vld [vmem:[%s1827_s5 + $0x28] sm:$0xff]  ;;  %v754_v36 = vld [vmem:[%s1827_s5 + $0x30] sm:$0xff]  ;;  %s884_s18 = sshll.u32 %s459_s29, 4  ;;  %s870_s30 = scalar_lea.sflag [#allocation4], %s1654_s23  ;;  %s1774_s18 = int_to_ptr.vmem [resolvable:$true] %s884_s18 }
  0x83   : > { %1125 = vmatpush3.bf16.msra.mxu0 %v1124_v13  ;;  %v1145_v35 = vpack.c.bf16 %v753_v34, %v752_v33  ;;  %v755_v37 = vld [vmem:[%s1827_s5 + $0x38] sm:$0xff]  ;;  %v1035_v45 = vld [vmem:[%s1826_s4] ss:$0 sm:$0xff]  ;;  %s1317_s8 = scalar_lea.vmem %s1774_s18, 128  ;;  %p1870_p10 = scmp.ne.s32.totalorder %s1853_s22, 0 }
  0x84   : > { %1131 = vmatpush3.bf16.msra.mxu1 %v1130_v16  ;;  %1132 = vmatprep.subr.bf16.mxu0 %v1408_v0  ;;  %v1148_v38 = vpack.c.bf16 %v755_v37, %v754_v36  ;;  %v1036_v50 = vld [vmem:[%s1828_s6] ss:$0 sm:$0xff]  ;;  %p1318_p4 = scmp.ne.s32.totalorder %s1774_s18, %s1317_s8  ;;  %s1411_s12 = smov [#allocation8]  }
  0x85   : > { %1138 = vmatprep.subr.bf16.mxu1 %v1408_v0  ;;  %s1321_s17 = sshll.u32 %s1411_s12, 4  ;;  %s1322_s17 = int_to_ptr.vmem [resolvable:$false] %s1321_s17 }
  0x86   : > { %1077 = vmatmul.mubr.msk.f32.vlgmr.msra.gmra.mrb[0].mxu0 %vm507_vm2, %v502_v19  ;;  %v1039_v3 = vld [vmem:[%s1868_s14] ss:$0 sm:$0xff]  ;;  %p1319_p12 = pnand %p1318_p4, %p1870_p10  ;;  %s1323_s15 = scalar_lea.vmem %s1322_s17, 256 }
  0x87   : > { %1088 = vmatmul.mubr.msk.f32.vlgmr.msra.gmra.mrb[0].mxu1 %vm507_vm2, %v1697_v12  ;;  %1134 = vmatpush3.bf16.msra.mxu0 %v1133_v20  ;;  %s1772_s13 = scalar_lea.hbm %s1869_s19, %s1041_s26  ;;  %p1324_p8 = scmp.lt.s32.totalorder %s1774_s18, %s1322_s17 }
  0x88   : > { %1135 = vmatprep.subr.bf16.mxu0 %v1408_v0  ;;  %1098 = vmatprep.mubr.msk.f32.mxu0 %vm1409_vm0, %v1410_v1  ;;  %p1320_p1 = pneg %p1319_p12  ;;  %p1325_p9 = scmp.lt.s32.totalorder %s1323_s15, %s1317_s8 }
  0x89   : > { %1117 = vmatprep.mubr.msk.f32.mxu1 %vm1409_vm0, %v1410_v1  ;;  %1140 = vmatpush3.bf16.msra.mxu1 %v1139_v29  ;;  %v1038_v1 = vld [vmem:[%s1867_s16] ss:$0 sm:$0xff] }
  0x8a   : > { %1141 = vmatprep.subr.bf16.mxu1 %v1408_v0  ;;  %p1326_p6 = por %p1325_p9, %p1324_p8 }
  0x8b   : > { %1137 = vmatpush3.bf16.msra.mxu0 %v1136_v23 }
  0x8c   : > { %p1327_p13 = pnand %p1326_p6, %p1320_p1 }
  0x8d   : > { %1143 = vmatpush3.bf16.msra.mxu1 %v1142_v32 }
  0x8e   : > { %1099 = vmatmul.mubr.msk.f32.vlgmr.msra.gmra.mrb[2].mxu0 %vm507_vm2, %v659_v26  ;;  %1144 = vmatprep.subr.bf16.mxu1 %v1408_v0 }
  0x91   : > { %1146 = vmatpush3.bf16.msra.mxu1 %v1145_v35 }
  0x92   : > { %1147 = vmatprep.subr.bf16.mxu1 %v1408_v0 }
  0x95   : > { %1149 = vmatpush3.bf16.msra.mxu1 %v1148_v38 }
 0x159   : > { %v577_v39 = vpop.f32.mrb[0].mxu0 }
 0x15a   : > { %v1078_v40 = vpop.f32.mrb[1].mxu0  ;;  %v649_v41 = vpop.f32.mrb[0].mxu1 }
 0x15b   : > { %v650_v42 = vadd.f32 %v649_v41, %v577_v39  ;;  %v1089_v43 = vpop.f32.mrb[1].mxu1 }
 0x161   : > { %v734_v44 = vpop.f32.mrb[2].mxu0 }
 0x162   : > { %v738_v46 = vadd.f32 %v734_v44, %v650_v42  ;;  %v1100_v47 = vpop.f32.mrb[3].mxu0 }
 0x164   : > { %v746_v48 = vadd.f32 %v1035_v45, %v738_v46 }
 0x166   : > { %v747_v49 = vmax.f32 %v746_v48, 0.0 }
 0x168   : > { %1118 = vmatmul.mubr.msk.f32.vlgmr.msra.gmra.mrb[2].mxu1 %vm763_vm4, %v747_v49 }
 0x23b   : > { %v833_v51 = vpop.f32.mrb[2].mxu1 }
 0x23c   : > { %v834_v52 = vadd.f32 %v1036_v50, %v833_v51  ;;  %v1119_v53 = vpop.f32.mrb[3].mxu1 }
 0x23e   : > { %v837_v54 = vadd.f32 %v834_v52, %v1697_v12 }
 0x240   : > { %v838_v55 = vsel %vm507_vm2, %v837_v54, 0.0 }
 0x241   : > { %839 = vadd.xlane.f32.xlu0 %v838_v55 }
 0x2ce   : > { %v840_v56 = vpop.xlane.xlu0 %839 }
 0x2cf   : > { %v842_v57 = vmul.f32 0.03125, %v840_v56 }
 0x2d1   : > { %v843_v58 = vsub.f32 %v837_v54, %v842_v57 }
 0x2d3   : > { %v844_v59 = vmul.f32 %v843_v58, %v843_v58 }
 0x2d5   : > { %v845_v60 = vsel %vm507_vm2, %v844_v59, 0.0 }
 0x2d6   : > { %846 = vadd.xlane.f32.xlu0 %v845_v60 }
 0x363   : > { %v847_v61 = vpop.xlane.xlu0 %846 }
 0x364   : > { %v848_v62 = vmul.f32 0.03125, %v847_v61 }
 0x366   : > { %v849_v63 = vadd.f32 1e-05, %v848_v62 }
 0x368   : > { %1225 = vrsqrt.f32 %v849_v63 }
 0x372   : > { %v1226_v0 = vpop.eup %1225 }
 0x373   : > { %v851_v2 = vmul.f32 %v1226_v0, %v843_v58 }
 0x375   : > { %v859_v4 = vmul.f32 %v1038_v1, %v851_v2 }
 0x377   : > { %v867_v5 = vadd.f32 %v1039_v3, %v859_v4 }
 0x379   : > { %868 = vst.msk [vmem:[%s459_s29] sm:$0xff] %vm507_vm2, %v867_v5 }
 0x37a   : > { %1330 = shalt.err (!%p1327_p13)
}
 0x37b   : > { %s1331_s23 = scalar_lea.hbm %s1772_s13, 128  ;;  %s1335_s20 = scalar_lea.hbm %s1869_s19, 256 }
 0x37c   : > { %p1332_p11 = scmp.ne.s32.totalorder %s1772_s13, %s1331_s23  ;;  %p1336_p7 = scmp.lt.u32.totalorder %s1772_s13, %s1869_s19 }
 0x37d   : > { %p1337_p3 = scmp.lt.u32.totalorder %s1335_s20, %s1331_s23  ;;  %p1339_p4 = scmp.lt.u32.totalorder %s1331_s23, %s1772_s13 }
 0x37e   : > { %p1333_p2 = pnand %p1332_p11, %p1870_p10 }
 0x37f   : > { %p1338_p0 = por %p1337_p3, %p1336_p7 }
 0x380   : > { %p1334_p5 = pneg %p1333_p2 }
 0x381   : > { %p1340_p12 = por %p1339_p4, %p1338_p0 }
 0x383   : > { %p1341_p1 = pnand %p1340_p12, %p1334_p5 }
 0x385   : > { %1344 = shalt.err (!%p1341_p1)
}
 0x386   : > { %1156 = dma.vmem_to_hbm [thread:$0]  (%p1870_p10), %s1774_s18, 128, %s1772_s13, %s870_s30  }
 0x387 PF: > { %s1871_s16 = sld [smem:[#allocation12_spill]]  ;;  %s1872_s1 = sld [smem:[#allocation17_spill]] }
 0x388   : > { %s1873_s27 = sld [smem:[#allocation14_spill]] }
 0x38d   : > { %s896_s14 = sand.u32 1, %s1871_s16   ;;  %p1874_p8 = scmp.ne.s32.totalorder %s1872_s1, 0 }
 0x38e   : > { %p1875_p9 = scmp.ge.s32.totalorder %s1873_s27, 2  ;;  %s897_s26 = scalar_lea.sflag [#allocation4], %s896_s14 }
 0x390   : > { %p1169_p6 = pnand %p1875_p9, %p1874_p8 }
 0x392   : > { %1378 = dma.done.wait (!%p1169_p6), %s897_s26, 128  }
 0x393   : > { %1380 = vsyncadd (!%p1169_p6), %s897_s26, 4294967168  ;;  %s28_s14 = sadd.s32 1, %s1873_s27   ;;  %s1876_s22 = sld [smem:[#allocation16_spill]] }
 0x394   : > { %p25_p13 = scmp.ge.s32.totalorder %s28_s14, 4   ;;  %s1877_s12 = sld [smem:[#allocation13_spill]] }
 0x395   : > { %s1878_s13 = sld [smem:[#allocation15_spill]]  ;;  %s1879_s30 = smov %s1387_s10 }
 0x396   : > { %s1880_s10 = smov %s1391_s11  ;;  %27 = sbr.rel (!%p25_p13) target bundleno = 13 (0xd), region = 127 }
 0x399   : > { %s1881_s11 = smov %s1876_s22 }
 0x39d   :  { %902 = vsyncpa [#allocation3], 1 }
 0x39e   :  { %904 = vsyncpa [#allocation3 + $0x1], 1 }
 0x39f   :  { %905 = vsyncpa [#allocation6], 1 }
 0x3a0   :  { %907 = vsyncpa [#allocation6 + $0x1], 1 }
 0x3a1   :  { %908 = vsyncpa [#allocation4], 1 }
 0x3a2   :  { %910 = vsyncpa [#allocation4 + $0x1], 1 }

</bundles_post_ra>
